<compile_context>
chip_gen: v6e
topology: v6e:2x2x1
jax: 0.10.0
libtpu: 0.0.40
codegen_flags: <defaults>
</compile_context>

<pallas_src>
import functools

import numpy as np
import jax
import jax.numpy as jnp
from jax.experimental import pallas as pl
from jax.experimental.pallas import tpu as pltpu


def _round_up(v, m):
  return (v + m - 1) // m * m


def _lead_refiner_kernel(x_ref, yh_ref, seq_ref, r_ref, state_ref,
                         cls_w_ref, mixcat_ref, dft_ref, wbig_ref, bbig_ref,
                         ir_ref, temp_ref, out_ref):
  TR = x_ref.shape[0]                      # rows in this tile (multiple of 8)
  K = seq_ref.shape[0]                     # number of leaders (leading block dim)
  FP = dft_ref.shape[1] // 2               # padded rfft width (multiple of 128)

  inv_t = 1.0 / temp_ref[0]                # SMEM scalar first (avoid sld stalls)

  x = x_ref[...]                           # (TR, L)
  yh = yh_ref[...]                         # (TR, PP)  zero past P
  rr = r_ref[...]                          # (TR, K)

  # ---- instance norm over the lookback (time) axis ----
  mu = jnp.mean(x, axis=-1, keepdims=True)
  xc = x - mu
  var = jnp.mean(xc * xc, axis=-1, keepdims=True) + 1e-8
  inv_std = jax.lax.rsqrt(var)             # EUP slot
  std = var * inv_std                      # sqrt(var) without a second sqrt/div
  yhn = (yh - mu) * inv_std                # padded lanes harmless: DFT rows >= P are 0

  # ---- leader softmax over [1, |r|] / temperature ("ones" column folded) ----
  logits = jnp.abs(rr) * inv_t             # (TR, K)
  m = jnp.maximum(jnp.max(logits, axis=-1, keepdims=True), inv_t)
  e = jnp.exp(logits - m)
  denom = jnp.exp(inv_t - m) + jnp.sum(e, axis=-1, keepdims=True)
  corr = e / denom                         # softmax[..., 1:]  (TR, K)

  # ---- FilterFactory: state softmax + fused state-mixture matmul ----
  p_logits = state_ref[...] + jnp.dot(x, cls_w_ref[...],
                                      preferred_element_type=jnp.float32)
  p_max = jnp.max(p_logits, axis=-1, keepdims=True)
  pe = jnp.exp(p_logits - p_max)
  p = pe / jnp.sum(pe, axis=-1, keepdims=True)            # (TR, S)

  S = p.shape[-1]
  # feat = [p_s * corr_k for all (s,k)] ++ [p]  -> single small operand
  wcorr = jnp.concatenate([p[:, s:s + 1] * corr for s in range(S)], axis=-1)
  feat = jnp.concatenate([wcorr, p], axis=-1)             # (TR, S*K + S)
  filt = jnp.dot(feat, mixcat_ref[...],
                 preferred_element_type=jnp.float32)      # (TR, (2K+1)*FP)

  # ---- rfft via one fused [cos | -sin] matrix ----
  dft = dft_ref[...]                                      # (PP, 2*FP)
  Yc = jnp.dot(yhn, dft, preferred_element_type=jnp.float32)   # (TR, 2FP)
  Yr, Yi = Yc[:, :FP], Yc[:, FP:]

  # ---- per-leader filter application; rfft matmul interleaved with VPU work ----
  acc_sr = jnp.zeros((TR, FP), jnp.float32)
  acc_si = jnp.zeros((TR, FP), jnp.float32)
  acc_dr = jnp.zeros((TR, FP), jnp.float32)
  acc_di = jnp.zeros((TR, FP), jnp.float32)
  for k in range(K):                                      # static unroll
    Sc = jnp.dot(seq_ref[k], dft, preferred_element_type=jnp.float32)  # (TR, 2FP)
    Sr, Si = Sc[:, :FP], Sc[:, FP:]
    f_lead = filt[:, k * FP:(k + 1) * FP]                 # lane-aligned slices
    f_diff = filt[:, (K + k) * FP:(K + k + 1) * FP]
    acc_sr = acc_sr + Sr * f_lead
    acc_si = acc_si + Si * f_lead
    acc_dr = acc_dr + (Sr - Yr) * f_diff
    acc_di = acc_di + (Si - Yi) * f_diff

  f_y = filt[:, 2 * K * FP:(2 * K + 1) * FP]

  # ---- complex mix layer + irfft, fused into two matmuls ----
  Z = jnp.concatenate([acc_sr, acc_dr, Yr * f_y,
                       acc_si, acc_di, Yi * f_y], axis=-1)            # (TR, 6FP)
  O = bbig_ref[...] + jnp.dot(Z, wbig_ref[...],
                              preferred_element_type=jnp.float32)     # (TR, 2FP)
  delta = jnp.dot(O, ir_ref[...], preferred_element_type=jnp.float32)  # (TR, PP)

  # (yhn + delta) * std + mu  ==  y_hat + delta * std
  out_ref[...] = yh + delta * std


@functools.partial(jax.jit, static_argnames=("row_tile",))
def lead_refiner_pallas(x, y_hat, seq_shifted, r, params, *, row_tile=128):
  B, C, L = x.shape
  P = y_hat.shape[-1]
  K = seq_shifted.shape[2]
  assert P % 2 == 0, "irfft DFT matrices assume even pred_len"
  F = P // 2 + 1
  S = params["mix_b"].shape[0]
  OUT = params["mix_b"].shape[1]
  assert OUT == F * (2 * K + 1)

  FP = _round_up(F, 128)          # padded frequency axis (lane tile)
  PP = _round_up(P, 128)          # padded prediction axis (lane-dense store)
  OUTP = (2 * K + 1) * FP
  R = B * C
  TR = row_tile if R >= row_tile else _round_up(R, 8)
  R_pad = _round_up(R, TR)
  ntiles = R_pad // TR
  f32 = jnp.float32

  def pad2(a, rows, cols):
    return jnp.pad(a, ((0, rows - a.shape[0]), (0, cols - a.shape[1])))

  # ---- activations: fold (B, C) into one row axis, pad rows / lanes ----
  x_rows = pad2(x.reshape(R, L).astype(f32), R_pad, L)
  yh_rows = pad2(y_hat.reshape(R, P).astype(f32), R_pad, PP)
  r_rows = pad2(r.reshape(R, K).astype(f32), R_pad, K)

  # leaders as (K, rows, P): single transpose, no extra tile-major reshuffle
  seq_rows = jnp.transpose(seq_shifted, (2, 0, 1, 3)).reshape(K, R, P).astype(f32)
  seq_rows = jnp.pad(seq_rows, ((0, 0), (0, R_pad - R), (0, PP - P)))

  # per-row classifier bias (factory bias + per-channel basic state, broadcast over B)
  state_rows = jnp.tile(params["fbias"] + params["basic_state"], (B, 1)).astype(f32)
  state_rows = pad2(state_rows, R_pad, S)

  # ---- FilterFactory weights: one (S*K + S, OUTP) matrix, F zero-padded per head ----
  mix_w = params["mix_w"].reshape(S, K, 2 * K + 1, F)
  mix_w = jnp.pad(mix_w, ((0, 0), (0, 0), (0, 0), (0, FP - F))).reshape(S * K, OUTP)
  mix_b = params["mix_b"].reshape(S, 2 * K + 1, F)
  mix_b = jnp.pad(mix_b, ((0, 0), (0, 0), (0, FP - F))).reshape(S, OUTP)
  mixcat = jnp.concatenate([mix_w, mix_b], axis=0).astype(f32)

  # ---- real DFT matrices (trace-time constants under jit) ----
  t = np.arange(P, dtype=np.float64)[:, None]
  fr = np.arange(F, dtype=np.float64)[None, :]
  ang = 2.0 * np.pi * t * fr / P
  cos, sin = np.cos(ang), np.sin(ang)
  dft_np = np.zeros((PP, 2 * FP), np.float32)       # rows >= P and cols >= F are zero
  dft_np[:P, :F] = cos
  dft_np[:P, FP:FP + F] = -sin
  w = np.where((np.arange(F) == 0) | (np.arange(F) == F - 1), 1.0, 2.0)[:, None]
  ir_np = np.zeros((2 * FP, PP), np.float32)
  ir_np[:F, :P] = w * cos.T / P
  ir_np[FP:FP + F, :P] = -w * sin.T / P
  dft = jnp.asarray(dft_np)
  ir_big = jnp.asarray(ir_np)

  # ---- complex mix layer as a real 2x2 block matrix, chunks stacked on rows ----
  def pad_ff(a):
    return jnp.pad(a, ((0, FP - F), (0, FP - F)))
  wr = jnp.concatenate([pad_ff(params["mlw_re"][j]) for j in range(3)], axis=0)
  wi = jnp.concatenate([pad_ff(params["mlw_im"][j]) for j in range(3)], axis=0)
  w_big = jnp.concatenate(
      [jnp.concatenate([wr, wi], axis=1),
       jnp.concatenate([-wi, wr], axis=1)], axis=0).astype(f32)      # (6FP, 2FP)
  b_big = jnp.concatenate(
      [jnp.pad(params["mlb_re"], ((0, 0), (0, FP - F))),
       jnp.pad(params["mlb_im"], ((0, 0), (0, FP - F)))], axis=1).astype(f32)

  grid_spec = pltpu.PrefetchScalarGridSpec(
      num_scalar_prefetch=0,
      grid=(ntiles,),
      in_specs=[
          pl.BlockSpec((TR, L), lambda i: (i, 0)),               # x rows
          pl.BlockSpec((TR, PP), lambda i: (i, 0)),              # y_hat rows
          pl.BlockSpec((K, TR, PP), lambda i: (0, i, 0)),        # leaders (K-major)
          pl.BlockSpec((TR, K), lambda i: (i, 0)),               # r rows
          pl.BlockSpec((TR, S), lambda i: (i, 0)),               # classifier bias rows
          pl.BlockSpec((L, S), lambda i: (0, 0)),                # classifier weight
          pl.BlockSpec((S * K + S, OUTP), lambda i: (0, 0)),     # fused mixture weights
          pl.BlockSpec((PP, 2 * FP), lambda i: (0, 0)),          # forward DFT [cos|-sin]
          pl.BlockSpec((6 * FP, 2 * FP), lambda i: (0, 0)),      # complex mix weights
          pl.BlockSpec((1, 2 * FP), lambda i: (0, 0)),           # complex mix bias
          pl.BlockSpec((2 * FP, PP), lambda i: (0, 0)),          # inverse DFT
          pl.BlockSpec(memory_space=pltpu.MemorySpace.SMEM),     # temperature scalar
      ],
      out_specs=pl.BlockSpec((TR, PP), lambda i: (i, 0)),
  )

  # VMEM budget: double-buffered blocks + slack, kept under the v7x 64 MiB physical.
  block_bytes = 4 * (TR * L + TR * PP + K * TR * PP + TR * K + TR * S + L * S
                     + (S * K + S) * OUTP + PP * 2 * FP + 6 * FP * 2 * FP
                     + 2 * FP + 2 * FP * PP + TR * PP)
  vmem_limit = int(min(max(2 * block_bytes + (8 << 20), 32 << 20), 48 << 20))

  out = pl.pallas_call(
      _lead_refiner_kernel,
      out_shape=jax.ShapeDtypeStruct((R_pad, PP), jnp.float32),
      grid_spec=grid_spec,
      compiler_params=pltpu.CompilerParams(
          dimension_semantics=("parallel",),
          vmem_limit_bytes=vmem_limit),
  )(x_rows, yh_rows, seq_rows, r_rows, state_rows,
    params["cls_w"], mixcat, dft, w_big, b_big, ir_big,
    params["temperature"])

  return out[:R, :P].reshape(B, C, P)


def lead_refiner_reference(x, y_hat, seq_shifted, r, params):
  """Pure-JAX reference (jnp.fft, HIGHEST-precision einsums) for verification."""
  HP = jax.lax.Precision.HIGHEST
  B, C, L = x.shape
  P = y_hat.shape[-1]
  K = seq_shifted.shape[2]
  F = P // 2 + 1
  mu = jnp.mean(x, axis=-1, keepdims=True)
  xc = x - mu
  std = jnp.sqrt(jnp.mean(xc * xc, axis=-1, keepdims=True) + 1e-8)
  yhn = (y_hat - mu) / std
  temp = params["temperature"][0]
  rcat = jnp.concatenate([jnp.ones((B, C, 1), jnp.float32), jnp.abs(r)], -1) / temp
  corr = jax.nn.softmax(rcat, axis=-1)[..., 1:]
  logits = params["fbias"] + params["basic_state"] + jnp.einsum(
      "bcl,ls->bcs", x, params["cls_w"], precision=HP)
  p = jax.nn.softmax(logits, axis=-1)
  filt = jnp.einsum("bcs,bck,sko->bco", p, corr, params["mix_w"], precision=HP) \
       + jnp.einsum("bcs,so->bco", p, params["mix_b"], precision=HP)
  filt = filt.reshape(B, C, 2 * K + 1, F)
  yhf = jnp.fft.rfft(yhn)
  ssf = jnp.fft.rfft(seq_shifted)
  diff = (ssf - yhf[:, :, None, :]) * filt[:, :, K:-1]
  ssf2 = ssf * filt[:, :, :K]
  yhf2 = yhf * filt[:, :, -1]
  z = jnp.concatenate([ssf2.sum(2), diff.sum(2), yhf2], -1)
  wz = (params["mlw_re"] + 1j * params["mlw_im"]).reshape(3 * F, F)
  bz = (params["mlb_re"] + 1j * params["mlb_im"])[0]
  out = jnp.einsum("bcf,fo->bco", z, wz, precision=HP) + bz
  delta = jnp.fft.irfft(out, n=P)
  return (yhn + delta) * std + mu


if __name__ == "__main__":
  # small, LeadRefiner-consistent shapes
  B, C = 2, 4
  seq_len, pred_len = 16, 8
  K, S = 3, 4                      # K leaders, state_num = 4
  F = pred_len // 2 + 1            # trunc_tail = 0
  OUT = F * (2 * K + 1)

  key = jax.random.PRNGKey(0)
  ks = jax.random.split(key, 13)
  x = jax.random.normal(ks[0], (B, C, seq_len), jnp.float32)
  y_hat = jax.random.normal(ks[1], (B, C, pred_len), jnp.float32)
  # precomputed outputs of shifted_leader_seq (see TODO at top)
  seq_shifted = jax.random.normal(ks[2], (B, C, K, pred_len), jnp.float32)
  r_corr = jax.random.normal(ks[3], (B, C, K), jnp.float32)

  params = {
      "cls_w": 0.1 * jax.random.normal(ks[4], (seq_len, S), jnp.float32),
      "basic_state": 0.1 * jax.random.normal(ks[5], (C, S), jnp.float32),
      "fbias": 0.1 * jax.random.normal(ks[6], (1, S), jnp.float32),
      "mix_w": 0.1 * jax.random.normal(ks[7], (S, K, OUT), jnp.float32),
      "mix_b": 0.1 * jax.random.normal(ks[8], (S, OUT), jnp.float32),
      "mlw_re": 0.2 * jax.random.normal(ks[9], (3, F, F), jnp.float32),
      "mlw_im": 0.2 * jax.random.normal(ks[10], (3, F, F), jnp.float32),
      "mlb_re": 0.1 * jax.random.normal(ks[11], (1, F), jnp.float32),
      "mlb_im": 0.1 * jax.random.normal(ks[12], (1, F), jnp.float32),
      "temperature": jnp.ones((1,), jnp.float32),
  }

  out = lead_refiner_pallas(x, y_hat, seq_shifted, r_corr, params)
  out = jax.block_until_ready(out)

  ref = jax.block_until_ready(
      lead_refiner_reference(x, y_hat, seq_shifted, r_corr, params))
  # Kernel matmuls run at DEFAULT MXU precision (bf16 passes) vs. an f32 FFT
  # reference, so the comparison tolerance is relaxed accordingly.
  np.testing.assert_allclose(np.asarray(out), np.asarray(ref),
                             rtol=4e-2, atol=4e-2)
  print("KERNEL_OK")
</pallas_src>

<mosaic_0001>
module attributes {stable_mosaic.version = 11 : i64} {
  func.func @_lead_refiner_kernel(%arg0: i32, %arg1: memref<8x16xf32, #tpu.memory_space<vmem>>, %arg2: memref<8x128xf32, #tpu.memory_space<vmem>>, %arg3: memref<3x8x128xf32, #tpu.memory_space<vmem>>, %arg4: memref<8x3xf32, #tpu.memory_space<vmem>>, %arg5: memref<8x4xf32, #tpu.memory_space<vmem>>, %arg6: memref<16x4xf32, #tpu.memory_space<vmem>>, %arg7: memref<16x896xf32, #tpu.memory_space<vmem>>, %arg8: memref<128x256xf32, #tpu.memory_space<vmem>>, %arg9: memref<768x256xf32, #tpu.memory_space<vmem>>, %arg10: memref<1x256xf32, #tpu.memory_space<vmem>>, %arg11: memref<256x128xf32, #tpu.memory_space<vmem>>, %arg12: memref<1xf32, #tpu.memory_space<smem>>, %arg13: memref<8x128xf32, #tpu.memory_space<vmem>>) attributes {dimension_semantics = [#tpu.dimension_semantics<parallel>], iteration_bounds = array<i64: 1>, scalar_prefetch = 0 : i64, scratch_operands = 0 : i64, tpu.core_type = #tpu.core_type<tc>, window_params = [{transform_indices = @transform_0, window_bounds = array<i64: 8, 16>}, {transform_indices = @transform_1, window_bounds = array<i64: 8, 128>}, {transform_indices = @transform_2, window_bounds = array<i64: 3, 8, 128>}, {transform_indices = @transform_3, window_bounds = array<i64: 8, 3>}, {transform_indices = @transform_4, window_bounds = array<i64: 8, 4>}, {pipeline_mode = #tpu.pipeline_mode<synchronous>, transform_indices = @transform_5, window_bounds = array<i64: 16, 4>}, {pipeline_mode = #tpu.pipeline_mode<synchronous>, transform_indices = @transform_6, window_bounds = array<i64: 16, 896>}, {pipeline_mode = #tpu.pipeline_mode<synchronous>, transform_indices = @transform_7, window_bounds = array<i64: 128, 256>}, {pipeline_mode = #tpu.pipeline_mode<synchronous>, transform_indices = @transform_8, window_bounds = array<i64: 768, 256>}, {pipeline_mode = #tpu.pipeline_mode<synchronous>, transform_indices = @transform_9, window_bounds = array<i64: 1, 256>}, {pipeline_mode = #tpu.pipeline_mode<synchronous>, transform_indices = @transform_10, window_bounds = array<i64: 256, 128>}, {transform_indices = @transform_11, window_bounds = array<i64: 1>}, {transform_indices = @transform_12, window_bounds = array<i64: 8, 128>}]} {
    %c0 = arith.constant 0 : index
    %0 = memref.load %arg12[%c0] : memref<1xf32, #tpu.memory_space<smem>>
    %cst = arith.constant 1.000000e+00 : f32
    %1 = arith.divf %cst, %0 : f32
    %c0_0 = arith.constant 0 : index
    %c0_1 = arith.constant 0 : index
    %2 = vector.load %arg1[%c0_0, %c0_1] : memref<8x16xf32, #tpu.memory_space<vmem>>, vector<8x16xf32>
    %c0_2 = arith.constant 0 : index
    %c0_3 = arith.constant 0 : index
    %3 = vector.load %arg2[%c0_2, %c0_3] : memref<8x128xf32, #tpu.memory_space<vmem>>, vector<8x128xf32>
    %c0_4 = arith.constant 0 : index
    %c0_5 = arith.constant 0 : index
    %4 = vector.load %arg4[%c0_4, %c0_5] : memref<8x3xf32, #tpu.memory_space<vmem>>, vector<8x3xf32>
    %cst_6 = arith.constant dense<0.000000e+00> : vector<8xf32>
    %5 = vector.multi_reduction <add>, %2, %cst_6 [1] : vector<8x16xf32> to vector<8xf32>
    %6 = vector.shape_cast %5 : vector<8xf32> to vector<8x1xf32>
    %cst_7 = arith.constant 1.600000e+01 : f32
    %7 = vector.broadcast %cst_7 : f32 to vector<8x1xf32>
    %8 = arith.divf %6, %7 : vector<8x1xf32>
    %9 = vector.broadcast %8 : vector<8x1xf32> to vector<8x16xf32>
    %10 = arith.subf %2, %9 : vector<8x16xf32>
    %11 = arith.mulf %10, %10 : vector<8x16xf32>
    %cst_8 = arith.constant dense<0.000000e+00> : vector<8xf32>
    %12 = vector.multi_reduction <add>, %11, %cst_8 [1] : vector<8x16xf32> to vector<8xf32>
    %13 = vector.shape_cast %12 : vector<8xf32> to vector<8x1xf32>
    %cst_9 = arith.constant 1.600000e+01 : f32
    %14 = vector.broadcast %cst_9 : f32 to vector<8x1xf32>
    %15 = arith.divf %13, %14 : vector<8x1xf32>
    %cst_10 = arith.constant 9.99999993E-9 : f32
    %16 = vector.broadcast %cst_10 : f32 to vector<8x1xf32>
    %17 = arith.addf %15, %16 : vector<8x1xf32>
    %18 = math.rsqrt %17 : vector<8x1xf32>
    %19 = arith.mulf %17, %18 : vector<8x1xf32>
    %20 = vector.broadcast %8 : vector<8x1xf32> to vector<8x128xf32>
    %21 = arith.subf %3, %20 : vector<8x128xf32>
    %22 = vector.broadcast %18 : vector<8x1xf32> to vector<8x128xf32>
    %23 = arith.mulf %21, %22 : vector<8x128xf32>
    %24 = math.absf %4 : vector<8x3xf32>
    %25 = vector.broadcast %1 : f32 to vector<8x3xf32>
    %26 = arith.mulf %24, %25 : vector<8x3xf32>
    %cst_11 = arith.constant dense<0xFF800000> : vector<8xf32>
    %27 = vector.multi_reduction <maximumf>, %26, %cst_11 [1] : vector<8x3xf32> to vector<8xf32>
    %28 = vector.shape_cast %27 : vector<8xf32> to vector<8x1xf32>
    %29 = vector.broadcast %1 : f32 to vector<8x1xf32>
    %30 = arith.maximumf %28, %29 : vector<8x1xf32>
    %31 = vector.broadcast %30 : vector<8x1xf32> to vector<8x3xf32>
    %32 = arith.subf %26, %31 : vector<8x3xf32>
    %33 = math.exp %32 : vector<8x3xf32>
    %34 = vector.broadcast %1 : f32 to vector<8x1xf32>
    %35 = arith.subf %34, %30 : vector<8x1xf32>
    %36 = math.exp %35 : vector<8x1xf32>
    %cst_12 = arith.constant dense<0.000000e+00> : vector<8xf32>
    %37 = vector.multi_reduction <add>, %33, %cst_12 [1] : vector<8x3xf32> to vector<8xf32>
    %38 = vector.shape_cast %37 : vector<8xf32> to vector<8x1xf32>
    %39 = arith.addf %36, %38 : vector<8x1xf32>
    %40 = vector.broadcast %39 : vector<8x1xf32> to vector<8x3xf32>
    %41 = arith.divf %33, %40 : vector<8x3xf32>
    %c0_13 = arith.constant 0 : index
    %c0_14 = arith.constant 0 : index
    %42 = vector.load %arg5[%c0_13, %c0_14] : memref<8x4xf32, #tpu.memory_space<vmem>>, vector<8x4xf32>
    %c0_15 = arith.constant 0 : index
    %c0_16 = arith.constant 0 : index
    %43 = vector.load %arg6[%c0_15, %c0_16] : memref<16x4xf32, #tpu.memory_space<vmem>>, vector<16x4xf32>
    %cst_17 = arith.constant dense<0.000000e+00> : vector<8x4xf32>
    %44 = tpu.matmul %2, %43, %cst_17 {dimension_numbers = #tpu.dot_dimension_numbers<[1], [0], [0], [1], [0, 0, 1, 1], [], []>} : vector<8x16xf32>, vector<16x4xf32>, vector<8x4xf32> -> vector<8x4xf32>
    %45 = arith.addf %42, %44 : vector<8x4xf32>
    %cst_18 = arith.constant dense<0xFF800000> : vector<8xf32>
    %46 = vector.multi_reduction <maximumf>, %45, %cst_18 [1] : vector<8x4xf32> to vector<8xf32>
    %47 = vector.shape_cast %46 : vector<8xf32> to vector<8x1xf32>
    %48 = vector.broadcast %47 : vector<8x1xf32> to vector<8x4xf32>
    %49 = arith.subf %45, %48 : vector<8x4xf32>
    %50 = math.exp %49 : vector<8x4xf32>
    %cst_19 = arith.constant dense<0.000000e+00> : vector<8xf32>
    %51 = vector.multi_reduction <add>, %50, %cst_19 [1] : vector<8x4xf32> to vector<8xf32>
    %52 = vector.shape_cast %51 : vector<8xf32> to vector<8x1xf32>
    %53 = vector.broadcast %52 : vector<8x1xf32> to vector<8x4xf32>
    %54 = arith.divf %50, %53 : vector<8x4xf32>
    %55 = vector.extract_strided_slice %54 {offsets = [0, 0], sizes = [8, 1], strides = [1, 1]} : vector<8x4xf32> to vector<8x1xf32>
    %56 = vector.broadcast %55 : vector<8x1xf32> to vector<8x3xf32>
    %57 = arith.mulf %56, %41 : vector<8x3xf32>
    %58 = vector.extract_strided_slice %54 {offsets = [0, 1], sizes = [8, 1], strides = [1, 1]} : vector<8x4xf32> to vector<8x1xf32>
    %59 = vector.broadcast %58 : vector<8x1xf32> to vector<8x3xf32>
    %60 = arith.mulf %59, %41 : vector<8x3xf32>
    %61 = vector.extract_strided_slice %54 {offsets = [0, 2], sizes = [8, 1], strides = [1, 1]} : vector<8x4xf32> to vector<8x1xf32>
    %62 = vector.broadcast %61 : vector<8x1xf32> to vector<8x3xf32>
    %63 = arith.mulf %62, %41 : vector<8x3xf32>
    %64 = vector.extract_strided_slice %54 {offsets = [0, 3], sizes = [8, 1], strides = [1, 1]} : vector<8x4xf32> to vector<8x1xf32>
    %65 = vector.broadcast %64 : vector<8x1xf32> to vector<8x3xf32>
    %66 = arith.mulf %65, %41 : vector<8x3xf32>
    %67 = tpu.concatenate %57, %60, %63, %66 in 1 : vector<8x3xf32>, vector<8x3xf32>, vector<8x3xf32>, vector<8x3xf32> -> vector<8x12xf32>
    %68 = tpu.concatenate %67, %54 in 1 : vector<8x12xf32>, vector<8x4xf32> -> vector<8x16xf32>
    %c0_20 = arith.constant 0 : index
    %c0_21 = arith.constant 0 : index
    %69 = vector.load %arg7[%c0_20, %c0_21] : memref<16x896xf32, #tpu.memory_space<vmem>>, vector<16x896xf32>
    %cst_22 = arith.constant dense<0.000000e+00> : vector<8x896xf32>
    %70 = tpu.matmul %68, %69, %cst_22 {dimension_numbers = #tpu.dot_dimension_numbers<[1], [0], [0], [1], [0, 0, 1, 1], [], []>} : vector<8x16xf32>, vector<16x896xf32>, vector<8x896xf32> -> vector<8x896xf32>
    %c0_23 = arith.constant 0 : index
    %c0_24 = arith.constant 0 : index
    %71 = vector.load %arg8[%c0_23, %c0_24] : memref<128x256xf32, #tpu.memory_space<vmem>>, vector<128x256xf32>
    %cst_25 = arith.constant dense<0.000000e+00> : vector<8x256xf32>
    %72 = tpu.matmul %23, %71, %cst_25 {dimension_numbers = #tpu.dot_dimension_numbers<[1], [0], [0], [1], [0, 0, 1, 1], [], []>} : vector<8x128xf32>, vector<128x256xf32>, vector<8x256xf32> -> vector<8x256xf32>
    %73 = vector.extract_strided_slice %72 {offsets = [0, 0], sizes = [8, 128], strides = [1, 1]} : vector<8x256xf32> to vector<8x128xf32>
    %74 = vector.extract_strided_slice %72 {offsets = [0, 128], sizes = [8, 128], strides = [1, 1]} : vector<8x256xf32> to vector<8x128xf32>
    %cst_26 = arith.constant 0.000000e+00 : f32
    %75 = vector.broadcast %cst_26 : f32 to vector<8x128xf32>
    %cst_27 = arith.constant 0.000000e+00 : f32
    %76 = vector.broadcast %cst_27 : f32 to vector<8x128xf32>
    %cst_28 = arith.constant 0.000000e+00 : f32
    %77 = vector.broadcast %cst_28 : f32 to vector<8x128xf32>
    %cst_29 = arith.constant 0.000000e+00 : f32
    %78 = vector.broadcast %cst_29 : f32 to vector<8x128xf32>
    %c0_30 = arith.constant 0 : index
    %c0_31 = arith.constant 0 : index
    %c0_32 = arith.constant 0 : index
    %79 = vector.load %arg3[%c0_30, %c0_31, %c0_32] : memref<3x8x128xf32, #tpu.memory_space<vmem>>, vector<1x8x128xf32>
    %80 = vector.shape_cast %79 : vector<1x8x128xf32> to vector<8x128xf32>
    %cst_33 = arith.constant dense<0.000000e+00> : vector<8x256xf32>
    %81 = tpu.matmul %80, %71, %cst_33 {dimension_numbers = #tpu.dot_dimension_numbers<[1], [0], [0], [1], [0, 0, 1, 1], [], []>} : vector<8x128xf32>, vector<128x256xf32>, vector<8x256xf32> -> vector<8x256xf32>
    %82 = vector.extract_strided_slice %81 {offsets = [0, 0], sizes = [8, 128], strides = [1, 1]} : vector<8x256xf32> to vector<8x128xf32>
    %83 = vector.extract_strided_slice %81 {offsets = [0, 128], sizes = [8, 128], strides = [1, 1]} : vector<8x256xf32> to vector<8x128xf32>
    %84 = vector.extract_strided_slice %70 {offsets = [0, 0], sizes = [8, 128], strides = [1, 1]} : vector<8x896xf32> to vector<8x128xf32>
    %85 = vector.extract_strided_slice %70 {offsets = [0, 384], sizes = [8, 128], strides = [1, 1]} : vector<8x896xf32> to vector<8x128xf32>
    %86 = arith.mulf %82, %84 : vector<8x128xf32>
    %87 = arith.addf %75, %86 : vector<8x128xf32>
    %88 = arith.mulf %83, %84 : vector<8x128xf32>
    %89 = arith.addf %76, %88 : vector<8x128xf32>
    %90 = arith.subf %82, %73 : vector<8x128xf32>
    %91 = arith.mulf %90, %85 : vector<8x128xf32>
    %92 = arith.addf %77, %91 : vector<8x128xf32>
    %93 = arith.subf %83, %74 : vector<8x128xf32>
    %94 = arith.mulf %93, %85 : vector<8x128xf32>
    %95 = arith.addf %78, %94 : vector<8x128xf32>
    %c1 = arith.constant 1 : index
    %c0_34 = arith.constant 0 : index
    %c0_35 = arith.constant 0 : index
    %96 = vector.load %arg3[%c1, %c0_34, %c0_35] : memref<3x8x128xf32, #tpu.memory_space<vmem>>, vector<1x8x128xf32>
    %97 = vector.shape_cast %96 : vector<1x8x128xf32> to vector<8x128xf32>
    %cst_36 = arith.constant dense<0.000000e+00> : vector<8x256xf32>
    %98 = tpu.matmul %97, %71, %cst_36 {dimension_numbers = #tpu.dot_dimension_numbers<[1], [0], [0], [1], [0, 0, 1, 1], [], []>} : vector<8x128xf32>, vector<128x256xf32>, vector<8x256xf32> -> vector<8x256xf32>
    %99 = vector.extract_strided_slice %98 {offsets = [0, 0], sizes = [8, 128], strides = [1, 1]} : vector<8x256xf32> to vector<8x128xf32>
    %100 = vector.extract_strided_slice %98 {offsets = [0, 128], sizes = [8, 128], strides = [1, 1]} : vector<8x256xf32> to vector<8x128xf32>
    %101 = vector.extract_strided_slice %70 {offsets = [0, 128], sizes = [8, 128], strides = [1, 1]} : vector<8x896xf32> to vector<8x128xf32>
    %102 = vector.extract_strided_slice %70 {offsets = [0, 512], sizes = [8, 128], strides = [1, 1]} : vector<8x896xf32> to vector<8x128xf32>
    %103 = arith.mulf %99, %101 : vector<8x128xf32>
    %104 = arith.addf %87, %103 : vector<8x128xf32>
    %105 = arith.mulf %100, %101 : vector<8x128xf32>
    %106 = arith.addf %89, %105 : vector<8x128xf32>
    %107 = arith.subf %99, %73 : vector<8x128xf32>
    %108 = arith.mulf %107, %102 : vector<8x128xf32>
    %109 = arith.addf %92, %108 : vector<8x128xf32>
    %110 = arith.subf %100, %74 : vector<8x128xf32>
    %111 = arith.mulf %110, %102 : vector<8x128xf32>
    %112 = arith.addf %95, %111 : vector<8x128xf32>
    %c2 = arith.constant 2 : index
    %c0_37 = arith.constant 0 : index
    %c0_38 = arith.constant 0 : index
    %113 = vector.load %arg3[%c2, %c0_37, %c0_38] : memref<3x8x128xf32, #tpu.memory_space<vmem>>, vector<1x8x128xf32>
    %114 = vector.shape_cast %113 : vector<1x8x128xf32> to vector<8x128xf32>
    %cst_39 = arith.constant dense<0.000000e+00> : vector<8x256xf32>
    %115 = tpu.matmul %114, %71, %cst_39 {dimension_numbers = #tpu.dot_dimension_numbers<[1], [0], [0], [1], [0, 0, 1, 1], [], []>} : vector<8x128xf32>, vector<128x256xf32>, vector<8x256xf32> -> vector<8x256xf32>
    %116 = vector.extract_strided_slice %115 {offsets = [0, 0], sizes = [8, 128], strides = [1, 1]} : vector<8x256xf32> to vector<8x128xf32>
    %117 = vector.extract_strided_slice %115 {offsets = [0, 128], sizes = [8, 128], strides = [1, 1]} : vector<8x256xf32> to vector<8x128xf32>
    %118 = vector.extract_strided_slice %70 {offsets = [0, 256], sizes = [8, 128], strides = [1, 1]} : vector<8x896xf32> to vector<8x128xf32>
    %119 = vector.extract_strided_slice %70 {offsets = [0, 640], sizes = [8, 128], strides = [1, 1]} : vector<8x896xf32> to vector<8x128xf32>
    %120 = arith.mulf %116, %118 : vector<8x128xf32>
    %121 = arith.addf %104, %120 : vector<8x128xf32>
    %122 = arith.mulf %117, %118 : vector<8x128xf32>
    %123 = arith.addf %106, %122 : vector<8x128xf32>
    %124 = arith.subf %116, %73 : vector<8x128xf32>
    %125 = arith.mulf %124, %119 : vector<8x128xf32>
    %126 = arith.addf %109, %125 : vector<8x128xf32>
    %127 = arith.subf %117, %74 : vector<8x128xf32>
    %128 = arith.mulf %127, %119 : vector<8x128xf32>
    %129 = arith.addf %112, %128 : vector<8x128xf32>
    %130 = vector.extract_strided_slice %70 {offsets = [0, 768], sizes = [8, 128], strides = [1, 1]} : vector<8x896xf32> to vector<8x128xf32>
    %131 = arith.mulf %73, %130 : vector<8x128xf32>
    %132 = arith.mulf %74, %130 : vector<8x128xf32>
    %133 = tpu.concatenate %121, %126, %131, %123, %129, %132 in 1 : vector<8x128xf32>, vector<8x128xf32>, vector<8x128xf32>, vector<8x128xf32>, vector<8x128xf32>, vector<8x128xf32> -> vector<8x768xf32>
    %c0_40 = arith.constant 0 : index
    %c0_41 = arith.constant 0 : index
    %134 = vector.load %arg10[%c0_40, %c0_41] : memref<1x256xf32, #tpu.memory_space<vmem>>, vector<1x256xf32>
    %c0_42 = arith.constant 0 : index
    %c0_43 = arith.constant 0 : index
    %135 = vector.load %arg9[%c0_42, %c0_43] : memref<768x256xf32, #tpu.memory_space<vmem>>, vector<768x256xf32>
    %cst_44 = arith.constant dense<0.000000e+00> : vector<8x256xf32>
    %136 = tpu.matmul %133, %135, %cst_44 {dimension_numbers = #tpu.dot_dimension_numbers<[1], [0], [0], [1], [0, 0, 1, 1], [], []>} : vector<8x768xf32>, vector<768x256xf32>, vector<8x256xf32> -> vector<8x256xf32>
    %137 = vector.broadcast %134 : vector<1x256xf32> to vector<8x256xf32>
    %138 = arith.addf %137, %136 : vector<8x256xf32>
    %c0_45 = arith.constant 0 : index
    %c0_46 = arith.constant 0 : index
    %139 = vector.load %arg11[%c0_45, %c0_46] : memref<256x128xf32, #tpu.memory_space<vmem>>, vector<256x128xf32>
    %cst_47 = arith.constant dense<0.000000e+00> : vector<8x128xf32>
    %140 = tpu.matmul %138, %139, %cst_47 {dimension_numbers = #tpu.dot_dimension_numbers<[1], [0], [0], [1], [0, 0, 1, 1], [], []>} : vector<8x256xf32>, vector<256x128xf32>, vector<8x128xf32> -> vector<8x128xf32>
    %141 = vector.broadcast %19 : vector<8x1xf32> to vector<8x128xf32>
    %142 = arith.mulf %140, %141 : vector<8x128xf32>
    %143 = arith.addf %3, %142 : vector<8x128xf32>
    %c0_48 = arith.constant 0 : index
    %c0_49 = arith.constant 0 : index
    %144 = vector.load %arg13[%c0_48, %c0_49] : memref<8x128xf32, #tpu.memory_space<vmem>>, vector<8x128xf32>
    tpu.vector_store %arg13[%c0_48, %c0_49], %143 {strides = array<i32>} : memref<8x128xf32, #tpu.memory_space<vmem>>, vector<8x128xf32>,
    return
  }
  func.func @transform_0(%arg0: i32) -> (i32, i32) {
    %c0_i32 = arith.constant 0 : i32
    %c0_i32_0 = arith.constant 0 : i32
    return %arg0, %c0_i32 : i32, i32
  }
  func.func @transform_1(%arg0: i32) -> (i32, i32) {
    %c0_i32 = arith.constant 0 : i32
    %c0_i32_0 = arith.constant 0 : i32
    return %arg0, %c0_i32 : i32, i32
  }
  func.func @transform_2(%arg0: i32) -> (i32, i32, i32) {
    %c0_i32 = arith.constant 0 : i32
    %c0_i32_0 = arith.constant 0 : i32
    %c0_i32_1 = arith.constant 0 : i32
    return %c0_i32, %arg0, %c0_i32_0 : i32, i32, i32
  }
  func.func @transform_3(%arg0: i32) -> (i32, i32) {
    %c0_i32 = arith.constant 0 : i32
    %c0_i32_0 = arith.constant 0 : i32
    return %arg0, %c0_i32 : i32, i32
  }
  func.func @transform_4(%arg0: i32) -> (i32, i32) {
    %c0_i32 = arith.constant 0 : i32
    %c0_i32_0 = arith.constant 0 : i32
    return %arg0, %c0_i32 : i32, i32
  }
  func.func @transform_5(%arg0: i32) -> (i32, i32) {
    %c0_i32 = arith.constant 0 : i32
    %c0_i32_0 = arith.constant 0 : i32
    %c0_i32_1 = arith.constant 0 : i32
    return %c0_i32, %c0_i32_0 : i32, i32
  }
  func.func @transform_6(%arg0: i32) -> (i32, i32) {
    %c0_i32 = arith.constant 0 : i32
    %c0_i32_0 = arith.constant 0 : i32
    %c0_i32_1 = arith.constant 0 : i32
    return %c0_i32, %c0_i32_0 : i32, i32
  }
  func.func @transform_7(%arg0: i32) -> (i32, i32) {
    %c0_i32 = arith.constant 0 : i32
    %c0_i32_0 = arith.constant 0 : i32
    %c0_i32_1 = arith.constant 0 : i32
    return %c0_i32, %c0_i32_0 : i32, i32
  }
  func.func @transform_8(%arg0: i32) -> (i32, i32) {
    %c0_i32 = arith.constant 0 : i32
    %c0_i32_0 = arith.constant 0 : i32
    %c0_i32_1 = arith.constant 0 : i32
    return %c0_i32, %c0_i32_0 : i32, i32
  }
  func.func @transform_9(%arg0: i32) -> (i32, i32) {
    %c0_i32 = arith.constant 0 : i32
    %c0_i32_0 = arith.constant 0 : i32
    %c0_i32_1 = arith.constant 0 : i32
    return %c0_i32, %c0_i32_0 : i32, i32
  }
  func.func @transform_10(%arg0: i32) -> (i32, i32) {
    %c0_i32 = arith.constant 0 : i32
    %c0_i32_0 = arith.constant 0 : i32
    %c0_i32_1 = arith.constant 0 : i32
    return %c0_i32, %c0_i32_0 : i32, i32
  }
  func.func @transform_11(%arg0: i32) -> i32 {
    %c0_i32 = arith.constant 0 : i32
    %c0_i32_0 = arith.constant 0 : i32
    return %c0_i32 : i32
  }
  func.func @transform_12(%arg0: i32) -> (i32, i32) {
    %c0_i32 = arith.constant 0 : i32
    %c0_i32_0 = arith.constant 0 : i32
    return %arg0, %c0_i32 : i32, i32
  }
}

</mosaic_0001>

<bundles_post_ra>
// kernel: lead_refiner_pallas.1
= control target key start
LH: loop header
LB: loop body
LE: loop exit
PB: predicated region body
PF: predicated region fallthrough
CT: control target
= control target key end

     0   :  { %v1527_v2 = vmov 0.0   ;;  %vm1528_vm0 = vmmov 0   ;;  %s2692_s0 = inlined_call_operand.vmem [shape: f32[8,16], index: 0, kind: input, shape index: {}]   ;;  %s2693_s1 = inlined_call_operand.vmem [shape: f32[8,128], index: 1, kind: input, shape index: {}]   ;;  %s2694_s2 = inlined_call_operand.vmem [shape: f32[3,8,128], index: 2, kind: input, shape index: {}]   ;;  %s2695_s3 = inlined_call_operand.vmem [shape: f32[8,3], index: 3, kind: input, shape index: {}]   ;;  %s2696_s4 = inlined_call_operand.vmem [shape: f32[8,4], index: 4, kind: input, shape index: {}]   ;;  %s2697_s5 = inlined_call_operand.vmem [shape: f32[16,4], index: 5, kind: input, shape index: {}]   ;;  %s2698_s6 = inlined_call_operand.vmem [shape: f32[16,896], index: 6, kind: input, shape index: {}]   ;;  %s2699_s7 = inlined_call_operand.vmem [shape: f32[128,256], index: 7, kind: input, shape index: {}]   ;;  %s2700_s8 = inlined_call_operand.vmem [shape: f32[768,256], index: 8, kind: input, shape index: {}]   ;;  %s2701_s9 = inlined_call_operand.vmem [shape: f32[1,256], index: 9, kind: input, shape index: {}]   ;;  %s2702_s10 = inlined_call_operand.vmem [shape: f32[256,128], index: 10, kind: input, shape index: {}]   ;;  %s2703_s11 = inlined_call_operand.<no memory space> [shape: f32[1], index: 11, kind: input, shape index: {}]   ;;  %s2704_s12 = inlined_call_operand.hbm [shape: f32[8,128], index: 12, kind: output, shape index: {}]  }
   0x1   :  { %v89_v0 = vld [vmem:[%s2697_s5 + $0x8] sm:$0xff]  ;;  %v44_v1 = vstv %s2703_s11  ;;  %1458 = vmatprep.subr.mxu0 %v1527_v2  ;;  %v88_v3 = vld [vmem:[%s2697_s5] sm:$0xff]  ;;  %1462 = vmatprep.mubr.msk.f32.mxu0 %vm1528_vm0, %v1527_v2 }
   0x2   :  { %1490 = vrcp.f32 %v44_v1 }
   0x3   :  { %18 = vsyncpa [#allocation4], 0  ;;  %1459 = vmatpush3.msra.mxu0 %v89_v0  ;;  %v1618_v4 = vld [vmem:[%s2692_s0] sm:$0xff]  ;;  %vm50_vm1 = vcmask 130048   ;;  %615 = vmatprep.mubr.f32.mxu1 %v1527_v2  ;;  %vm164_vm2 = vcmask 31744   ;;  %vm70_vm3 = vcmask 23552  }
   0x4   :  { %1460 = vmatprep.subr.mxu0 %v1527_v2  ;;  %v49_v6 = vld [vmem:[%s2695_s3] sm:$0xff]  ;;  %v1529_v27 = vmov 2   ;;  %v1530_v28 = vmov 1   ;;  %v1531_v32 = vmov 3   ;;  %v1532_v33 = vmov 0   ;;  %v226_v41 = vld [vmem:[%s2698_s6 + $0x38] sm:$0xff] }
   0x5   :  { %1461 = vmatpush3.msra.mxu0 %v88_v3  ;;  %v67_v7 = vand.u32 2147483647, %v49_v6  ;;  %v87_v8 = vld [vmem:[%s2696_s4] sm:$0xff]  ;;  %1486 = vset.pattern.permute.xlu1 %v1529_v27  ;;  %v51_v34 = vsel %vm50_vm1, %v1618_v4, 0.0  ;;  %v220_v42 = vld [vmem:[%s2698_s6 + $0x8] sm:$0xff]  ;;  %v229_v46 = vld [vmem:[%s2698_s6 + $0x50] sm:$0xff] }
   0x6   :  { %1463 = vmatmul.mubr.msk.f32.vlgmr.msra.gmra.mxu0 %vm50_vm1, %v1618_v4  ;;  %1485 = vset.pattern.permute.xlu0 %v1530_v28  ;;  %v227_v40 = vld [vmem:[%s2698_s6 + $0x40] sm:$0xff]  ;;  %s1533_s21 = smov 6   ;;  %s1534_s22 = smov 3   ;;  %v1660_v53 = vld [vmem:[%s2699_s7 + $0xf8] sm:$0xff]  ;;  %v1665_v54 = vld [vmem:[%s2699_s7 + $0xf0] sm:$0xff]  ;;  %vm210_vm4 = vcmask 48128  }
   0x7   :  { %300 = vmatprep.mubr.f32.mxu0 %v1527_v2  ;;  %264 = vmatprep.subr.mxu0 %v227_v40  ;;  %v219_v44 = vld [vmem:[%s2698_s6] sm:$0xff]  ;;  %s1535_s23 = smov 9   ;;  %s1536_s26 = smov 12   ;;  %v1671_v55 = vld [vmem:[%s2699_s7 + $0xe8] sm:$0xff]  ;;  %v1683_v57 = vld [vmem:[%s2699_s7 + $0xd8] sm:$0xff]  ;;  %vm212_vm5 = vcmask 72704  }
   0x8   :  { %265 = vmatpush1.msra.mxu0 %v226_v41  ;;  %551 = vmatprep.subr.mxu1 %v1660_v53  ;;  %v1677_v56 = vld [vmem:[%s2699_s7 + $0xe0] sm:$0xff]  ;;  %v1689_v58 = vld [vmem:[%s2699_s7 + $0xd0] sm:$0xff]  ;;  %v1695_v59 = vld [vmem:[%s2699_s7 + $0xc8] sm:$0xff]  ;;  %vm217_vm6 = vcmask 97280  }
   0x9   :  { %266 = vmatprep.subr.mxu0 %v220_v42  ;;  %552 = vmatpush1.msra.mxu1 %v1665_v54  ;;  %v1701_v60 = vld [vmem:[%s2699_s7 + $0xc0] sm:$0xff]  ;;  %v1707_v61 = vld [vmem:[%s2699_s7 + $0xb8] sm:$0xff]  ;;  %v1713_v62 = vld [vmem:[%s2699_s7 + $0xb0] sm:$0xff] }
   0xa   :  { %267 = vmatpush1.msra.mxu0 %v219_v44  ;;  %553 = vmatprep.subr.mxu1 %v1671_v55  ;;  %v1719_v63 = vld [vmem:[%s2699_s7 + $0xa8] sm:$0xff]  ;;  %v1725_v0 = vld [vmem:[%s2699_s7 + $0xa0] sm:$0xff]  ;;  %v1731_v1 = vld [vmem:[%s2699_s7 + $0x98] sm:$0xff] }
   0xb   :  { %335 = vmatprep.subr.mxu0 %v229_v46  ;;  %554 = vmatpush1.msra.mxu1 %v1677_v56  ;;  %v1737_v3 = vld [vmem:[%s2699_s7 + $0x90] sm:$0xff]  ;;  %v1749_v6 = vld [vmem:[%s2699_s7 + $0x80] sm:$0xff]  ;;  %v230_v41 = vld [vmem:[%s2698_s6 + $0x58] sm:$0xff] }
   0xc   :  { %555 = vmatprep.subr.mxu1 %v1683_v57  ;;  %v231_v40 = vld [vmem:[%s2698_s6 + $0x60] sm:$0xff]  ;;  %v224_v42 = vld [vmem:[%s2698_s6 + $0x28] sm:$0xff] }
   0xd   :  { %556 = vmatpush1.msra.mxu1 %v1689_v58  ;;  %v232_v44 = vld [vmem:[%s2698_s6 + $0x68] sm:$0xff]  ;;  %v622_v46 = vld [vmem:[%s2694_s2] sm:$0xff] }
   0xe   :  { %557 = vmatprep.subr.mxu1 %v1695_v59 }
   0xf   :  { %v1491_v5 = vpop.eup %1490  ;;  %558 = vmatpush1.msra.mxu1 %v1701_v60 }
  0x10   :  { %1472 = vpush %v1491_v5  ;;  %559 = vmatprep.subr.mxu1 %v1707_v61  ;;  %v1743_v5 = vld [vmem:[%s2699_s7 + $0x88] sm:$0xff] }
  0x11   :  { %560 = vmatpush1.msra.mxu1 %v1713_v62 }
  0x12   :  { %561 = vmatprep.subr.mxu1 %v1719_v63 }
  0x13   :  { %562 = vmatpush1.msra.mxu1 %v1725_v0 }
  0x14   :  { %563 = vmatprep.subr.mxu1 %v1731_v1 }
  0x15   :  { %564 = vmatpush1.msra.mxu1 %v1737_v3 }
  0x16   :  { %565 = vmatprep.subr.mxu1 %v1743_v5 }
  0x17   :  { %566 = vmatpush1.msra.mxu1 %v1749_v6 }
  0x41   :  { %s1473_s29 = spop %1472 }
  0x42   :  { %v68_v9 = vstv %s1473_s29 }
  0x43   :  { %v69_v12 = vmul.f32 %v68_v9, %v67_v7  ;;  %v1755_v7 = vld [vmem:[%s2699_s7 + $0x78] sm:$0xff] }
  0x44   :  { %567 = vmatprep.subr.mxu1 %v1755_v7 }
  0x45   :  { %v71_v15 = vsel %vm70_vm3, %v69_v12, -inf }
  0xc6   :  { %v159_v10 = vpop.f32.mrf.mxu0 }
  0xc7   :  { %v163_v11 = vadd.f32 %v159_v10, %v87_v8  ;;  %v1761_v8 = vld [vmem:[%s2699_s7 + $0x70] sm:$0xff]  ;;  %v1773_v10 = vld [vmem:[%s2699_s7 + $0x60] sm:$0xff] }
  0xc8   :  { %v1464_v13 = vpop.f32.mrf.mxu0  ;;  %568 = vmatpush1.msra.mxu1 %v1761_v8 }
  0xc9   :  { %v165_v14 = vsel %vm164_vm2, %v163_v11, -inf  ;;  %v1791_v13 = vld [vmem:[%s2699_s7 + $0x48] sm:$0xff] }
  0xca   :  { %166 = vmax.xlane.f32.xlu0 %v165_v14  ;;  %v1797_v14 = vld [vmem:[%s2699_s7 + $0x40] sm:$0xff] }
  0xce   :  { %72 = vmax.xlane.f32.xlu0 %v71_v15  ;;  %v1803_v15 = vld [vmem:[%s2699_s7 + $0x38] sm:$0xff] }
 0x153   :  { %v167_v16 = vpop.xlane.xlu0 %166 }
 0x154   :  { %v168_v17 = vsub.f32 %v163_v11, %v167_v16  ;;  %v1779_v11 = vld [vmem:[%s2699_s7 + $0x58] sm:$0xff]  ;;  %v1809_v16 = vld [vmem:[%s2699_s7 + $0x30] sm:$0xff] }
 0x156   :  { %v169_v18 = vmul.f32 1.442695, %v168_v17  ;;  %v1815_v17 = vld [vmem:[%s2699_s7 + $0x28] sm:$0xff] }
 0x157   :  { %v73_v19 = vpop.xlane.xlu0 %72 }
 0x158   :  { %1492 = vpow2.f32 %v169_v18  ;;  %v74_v20 = vmax.f32 %v73_v19, %v68_v9  ;;  %v1821_v18 = vld [vmem:[%s2699_s7 + $0x20] sm:$0xff]  ;;  %v1827_v19 = vld [vmem:[%s2699_s7 + $0x18] sm:$0xff] }
 0x15a   :  { %v75_v21 = vsub.f32 %v69_v12, %v74_v20  ;;  %v78_v35 = vsub.f32 %v68_v9, %v74_v20  ;;  %v1767_v9 = vld [vmem:[%s2699_s7 + $0x68] sm:$0xff]  ;;  %v1785_v12 = vld [vmem:[%s2699_s7 + $0x50] sm:$0xff] }
 0x15b   :  { %569 = vmatprep.subr.mxu1 %v1767_v9  ;;  %v1833_v20 = vld [vmem:[%s2699_s7 + $0x10] sm:$0xff] }
 0x15c   :  { %v76_v22 = vmul.f32 1.442695, %v75_v21  ;;  %v79_v36 = vmul.f32 1.442695, %v78_v35  ;;  %570 = vmatpush1.msra.mxu1 %v1773_v10  ;;  %v1839_v21 = vld [vmem:[%s2699_s7 + $0x8] sm:$0xff] }
 0x15d   :  { %571 = vmatprep.subr.mxu1 %v1779_v11 }
 0x15e   :  { %1494 = vpow2.f32 %v76_v22  ;;  %572 = vmatpush1.msra.mxu1 %v1785_v12  ;;  %v1845_v22 = vld [vmem:[%s2699_s7] sm:$0xff] }
 0x15f   :  { %573 = vmatprep.subr.mxu1 %v1791_v13 }
 0x160   :  { %574 = vmatpush1.msra.mxu1 %v1797_v14 }
 0x161   :  { %575 = vmatprep.subr.mxu1 %v1803_v15 }
 0x162   :  { %576 = vmatpush1.msra.mxu1 %v1809_v16 }
 0x163   :  { %577 = vmatprep.subr.mxu1 %v1815_v17 }
 0x164   :  { %578 = vmatpush1.msra.mxu1 %v1821_v18 }
 0x165   :  { %v1493_v23 = vpop.eup %1492  ;;  %579 = vmatprep.subr.mxu1 %v1827_v19 }
 0x166   :  { %v171_v24 = vsel %vm164_vm2, %v1493_v23, 0.0  ;;  %580 = vmatpush1.msra.mxu1 %v1833_v20 }
 0x167   :  { %172 = vadd.xlane.f32.xlu1 %v171_v24  ;;  %581 = vmatprep.subr.mxu1 %v1839_v21 }
 0x168   :  { %582 = vmatpush1.msra.mxu1 %v1845_v22 }
 0x169   :  { %706 = vmatprep.subr.mxu1 %v1660_v53 }
 0x16b   :  { %v1495_v25 = vpop.eup %1494 }
 0x16c   :  { %v81_v26 = vsel %vm70_vm3, %v1495_v25, 0.0 }
 0x16d   :  { %82 = vadd.xlane.f32.xlu1 %v81_v26 }
 0x1f0   :  { %v173_v29 = vpop.xlane.xlu1 %172 }
 0x1f1   :  { %1496 = vrcp.f32 %v173_v29 }
 0x1f2   :  { %1498 = vpow2.f32 %v79_v36 }
 0x1f6   :  { %v83_v37 = vpop.xlane.xlu1 %82 }
 0x1fe   :  { %v1497_v30 = vpop.eup %1496 }
 0x1ff   :  { %v175_v31 = vmul.f32 %v1497_v30, %v1493_v23  ;;  %v1499_v38 = vpop.eup %1498 }
 0x200   :  { %v84_v39 = vadd.f32 %v1499_v38, %v83_v37  ;;  %v222_v38 = vld [vmem:[%s2698_s6 + $0x18] sm:$0xff] }
 0x201   :  { %183 = vperm.xlu0 %1485, %v175_v31   ;;  %188 = vperm.xlu1 %1486, %v175_v31  }
 0x202   :  { %1500 = vrcp.f32 %v84_v39  ;;  %v221_v39 = vld [vmem:[%s2698_s6 + $0x10] sm:$0xff] }
 0x205   :  { %1487 = vset.pattern.permute.xlu0 %v1531_v32 }
 0x206   :  { %193 = vperm.xlu0 %1487, %v175_v31  }
 0x20a   :  { %1488 = vset.pattern.permute.xlu0 %v1532_v33 }
 0x20b   :  { %178 = vperm.xlu0 %1488, %v175_v31  }
 0x20f   :  { %1489 = vset.pattern.permute.xlu0 %v1531_v32  ;;  %v1501_v43 = vpop.eup %1500 }
 0x210   :  { %v1649_v45 = vmul.f32 %v1501_v43, %v1495_v25  ;;  %v223_v43 = vld [vmem:[%s2698_s6 + $0x20] sm:$0xff] }
 0x225   :  { %52 = vadd.xlane.f32.xlu1 %v51_v34 }
 0x27c   :  { %v189_v47 = vpop.permute.xlu1 %188  ;;  %v184_v48 = vpop.permute.xlu0 %183 }
 0x27d   :  { %v191_v49 = vmul.f32 %v189_v47, %v1649_v45  ;;  %v186_v50 = vmul.f32 %v184_v48, %v1649_v45 }
 0x27f   :  { %202 = vrot.lane.b32.xlu0 %v191_v49, %s1533_s21  ;;  %198 = vrot.lane.b32.xlu1 %v186_v50, %s1534_s22  ;;  %v1416_v50 = vld [vmem:[%s2694_s2 + $0x10] sm:$0xff] }
 0x281   :  { %v194_v51 = vpop.permute.xlu0 %193 }
 0x282   :  { %v196_v52 = vmul.f32 %v194_v51, %v1649_v45  ;;  %v48_v51 = vld [vmem:[%s2693_s1] sm:$0xff] }
 0x284   :  { %206 = vrot.lane.b32.xlu0 %v196_v52, %s1535_s23 }
 0x286   :  { %v179_v28 = vpop.permute.xlu0 %178 }
 0x288   :  { %214 = vrot.lane.b32.xlu0 %v175_v31, %s1536_s26  ;;  %v181_v31 = vmul.f32 %v179_v28, %v1649_v45  ;;  %v225_v45 = vld [vmem:[%s2698_s6 + $0x30] sm:$0xff]  ;;  %v952_v28 = vld [vmem:[%s2700_s8 + $0x278] sm:$0xff] }
 0x2ae   :  { %v53_v23 = vpop.xlane.xlu1 %52 }
 0x2af   :  { %v1850_v24 = vmul.f32 0.0625, %v53_v23 }
 0x2b1   :  { %v56_v25 = vsub.f32 %v1618_v4, %v1850_v24  ;;  %v228_v4 = vld [vmem:[%s2698_s6 + $0x48] sm:$0xff]  ;;  %v65_v52 = vsub.f32 %v48_v51, %v1850_v24  ;;  %v888_v24 = vld [vmem:[%s2700_s8 + $0x78] sm:$0xff] }
 0x2b2   :  { %v940_v51 = vld [vmem:[%s2700_s8 + $0x218] sm:$0xff] }
 0x2b3   :  { %v57_v26 = vmul.f32 %v56_v25, %v56_v25 }
 0x2b5   :  { %v58_v27 = vsel %vm50_vm1, %v57_v26, 0.0  ;;  %v953_v26 = vld [vmem:[%s2700_s8 + $0x280] sm:$0xff] }
 0x2b6   :  { %59 = vadd.xlane.f32.xlu1 %v58_v27  ;;  %v887_v27 = vld [vmem:[%s2700_s8 + $0x70] sm:$0xff] }
 0x2f1   :  { %v203_v29 = vpop.permute.xlu0 %202  ;;  %v199_v30 = vpop.permute.xlu1 %198 }
 0x2f2   :  { %v209_v32 = vsel %vm70_vm3, %v181_v31, %v199_v30  ;;  %v951_v30 = vld [vmem:[%s2700_s8 + $0x270] sm:$0xff]  ;;  %v885_v31 = vld [vmem:[%s2700_s8 + $0x60] sm:$0xff] }
 0x2f3   :  { %v211_v34 = vsel %vm210_vm4, %v209_v32, %v203_v29  ;;  %v886_v29 = vld [vmem:[%s2700_s8 + $0x68] sm:$0xff] }
 0x2f4   :  { %v950_v32 = vld [vmem:[%s2700_s8 + $0x268] sm:$0xff] }
 0x2f6   :  { %v207_v33 = vpop.permute.xlu0 %206 }
 0x2f7   :  { %v213_v35 = vsel %vm212_vm5, %v211_v34, %v207_v33  ;;  %v884_v33 = vld [vmem:[%s2700_s8 + $0x58] sm:$0xff]  ;;  %v949_v34 = vld [vmem:[%s2700_s8 + $0x260] sm:$0xff] }
 0x2fa   :  { %v215_v36 = vpop.permute.xlu0 %214 }
 0x2fb   :  { %v218_v37 = vsel %vm217_vm6, %v213_v35, %v215_v36  ;;  %v883_v35 = vld [vmem:[%s2700_s8 + $0x50] sm:$0xff]  ;;  %v948_v36 = vld [vmem:[%s2700_s8 + $0x258] sm:$0xff] }
 0x2fc   :  { %1411 = vmatmul.mubr.msk.f32.vlgmr.msra.gmra.mxu0 %vm50_vm1, %v218_v37 }
 0x2fd   :  { %336 = vmatpush1.msra.mxu0 %v228_v4  ;;  %371 = vmatprep.mubr.f32.mxu0 %v1527_v2  ;;  %v882_v4 = vld [vmem:[%s2700_s8 + $0x48] sm:$0xff] }
 0x2fe   :  { %337 = vmatprep.subr.mxu0 %v222_v38  ;;  %v881_v38 = vld [vmem:[%s2700_s8 + $0x40] sm:$0xff] }
 0x2ff   :  { %338 = vmatpush1.msra.mxu0 %v221_v39  ;;  %v946_v39 = vld [vmem:[%s2700_s8 + $0x248] sm:$0xff] }
 0x300   :  { %406 = vmatprep.subr.mxu0 %v231_v40  ;;  %1412 = vmatmul.mubr.msk.f32.vlgmr.msra.gmra.mxu0 %vm50_vm1, %v218_v37  ;;  %v880_v40 = vld [vmem:[%s2700_s8 + $0x38] sm:$0xff] }
 0x301   :  { %407 = vmatpush1.msra.mxu0 %v230_v41  ;;  %442 = vmatprep.mubr.f32.mxu0 %v1527_v2  ;;  %v945_v41 = vld [vmem:[%s2700_s8 + $0x240] sm:$0xff] }
 0x302   :  { %408 = vmatprep.subr.mxu0 %v224_v42  ;;  %v879_v42 = vld [vmem:[%s2700_s8 + $0x30] sm:$0xff] }
 0x303   :  { %409 = vmatpush1.msra.mxu0 %v223_v43  ;;  %v944_v43 = vld [vmem:[%s2700_s8 + $0x238] sm:$0xff] }
 0x304   :  { %1465 = vmatprep.subr.mxu0 %v1527_v2  ;;  %1413 = vmatmul.mubr.msk.f32.vlgmr.msra.gmra.mxu0 %vm50_vm1, %v218_v37 }
 0x305   :  { %1466 = vmatpush3.msra.mxu0 %v232_v44  ;;  %1469 = vmatprep.mubr.msk.f32.mxu0 %vm1528_vm0, %v1527_v2  ;;  %v878_v44 = vld [vmem:[%s2700_s8 + $0x28] sm:$0xff] }
 0x306   :  { %1467 = vmatprep.subr.mxu0 %v1527_v2 }
 0x307   :  { %1468 = vmatpush3.msra.mxu0 %v225_v45  ;;  %v943_v45 = vld [vmem:[%s2700_s8 + $0x230] sm:$0xff] }
 0x308   :  { %623 = vmatprep.subr.mxu0 %v1660_v53  ;;  %1470 = vmatmul.mubr.msk.f32.vlgmr.msra.gmra.mxu0 %vm50_vm1, %v218_v37  ;;  %v947_v37 = vld [vmem:[%s2700_s8 + $0x250] sm:$0xff] }
 0x309   :  { %624 = vmatpush1.msra.mxu0 %v1665_v54  ;;  %687 = vmatprep.mubr.f32.mxu0 %v1527_v2 }
 0x30a   :  { %625 = vmatprep.subr.mxu0 %v1671_v55 }
 0x30b   :  { %626 = vmatpush1.msra.mxu0 %v1677_v56 }
 0x30c   :  { %627 = vmatprep.subr.mxu0 %v1683_v57 }
 0x30d   :  { %628 = vmatpush1.msra.mxu0 %v1689_v58 }
 0x30e   :  { %629 = vmatprep.subr.mxu0 %v1695_v59 }
 0x30f   :  { %630 = vmatpush1.msra.mxu0 %v1701_v60 }
 0x310   :  { %631 = vmatprep.subr.mxu0 %v1707_v61 }
 0x311   :  { %632 = vmatpush1.msra.mxu0 %v1713_v62 }
 0x312   :  { %633 = vmatprep.subr.mxu0 %v1719_v63 }
 0x313   :  { %634 = vmatpush1.msra.mxu0 %v1725_v0 }
 0x314   :  { %635 = vmatprep.subr.mxu0 %v1731_v1 }
 0x315   :  { %636 = vmatpush1.msra.mxu0 %v1737_v3 }
 0x316   :  { %637 = vmatprep.subr.mxu0 %v1743_v5 }
 0x317   :  { %638 = vmatpush1.msra.mxu0 %v1749_v6 }
 0x318   :  { %639 = vmatprep.subr.mxu0 %v1755_v7 }
 0x319   :  { %640 = vmatpush1.msra.mxu0 %v1761_v8 }
 0x31a   :  { %641 = vmatprep.subr.mxu0 %v1767_v9 }
 0x31b   :  { %642 = vmatpush1.msra.mxu0 %v1773_v10 }
 0x31c   :  { %643 = vmatprep.subr.mxu0 %v1779_v11 }
 0x31d   :  { %644 = vmatpush1.msra.mxu0 %v1785_v12 }
 0x31e   :  { %645 = vmatprep.subr.mxu0 %v1791_v13 }
 0x31f   :  { %646 = vmatpush1.msra.mxu0 %v1797_v14 }
 0x320   :  { %647 = vmatprep.subr.mxu0 %v1803_v15 }
 0x321   :  { %648 = vmatpush1.msra.mxu0 %v1809_v16 }
 0x322   :  { %649 = vmatprep.subr.mxu0 %v1815_v17 }
 0x323   :  { %650 = vmatpush1.msra.mxu0 %v1821_v18 }
 0x324   :  { %651 = vmatprep.subr.mxu0 %v1827_v19 }
 0x325   :  { %652 = vmatpush1.msra.mxu0 %v1833_v20 }
 0x326   :  { %653 = vmatprep.subr.mxu0 %v1839_v21 }
 0x327   :  { %654 = vmatpush1.msra.mxu0 %v1845_v22 }
 0x328   :  { %688 = vmatmul.mubr.f32.vlgmr.msra.gmra.mxu0 %v622_v46  ;;  %789 = vmatprep.subr.mxu0 %v1660_v53  ;;  %v877_v46 = vld [vmem:[%s2700_s8 + $0x20] sm:$0xff] }
 0x329   :  { %790 = vmatpush1.msra.mxu0 %v1665_v54  ;;  %853 = vmatprep.mubr.f32.mxu0 %v1527_v2 }
 0x32a   :  { %791 = vmatprep.subr.mxu0 %v1671_v55 }
 0x32b   :  { %792 = vmatpush1.msra.mxu0 %v1677_v56 }
 0x32c   :  { %793 = vmatprep.subr.mxu0 %v1683_v57 }
 0x32d   :  { %794 = vmatpush1.msra.mxu0 %v1689_v58 }
 0x32e   :  { %795 = vmatprep.subr.mxu0 %v1695_v59 }
 0x32f   :  { %796 = vmatpush1.msra.mxu0 %v1701_v60 }
 0x330   :  { %797 = vmatprep.subr.mxu0 %v1707_v61 }
 0x331   :  { %798 = vmatpush1.msra.mxu0 %v1713_v62 }
 0x332   :  { %799 = vmatprep.subr.mxu0 %v1719_v63 }
 0x333   :  { %800 = vmatpush1.msra.mxu0 %v1725_v0 }
 0x334   :  { %801 = vmatprep.subr.mxu0 %v1731_v1 }
 0x335   :  { %802 = vmatpush1.msra.mxu0 %v1737_v3 }
 0x336   :  { %803 = vmatprep.subr.mxu0 %v1743_v5 }
 0x337   :  { %804 = vmatpush1.msra.mxu0 %v1749_v6 }
 0x338   :  { %805 = vmatprep.subr.mxu0 %v1755_v7 }
 0x339   :  { %806 = vmatpush1.msra.mxu0 %v1761_v8 }
 0x33a   :  { %807 = vmatprep.subr.mxu0 %v1767_v9 }
 0x33b   :  { %808 = vmatpush1.msra.mxu0 %v1773_v10 }
 0x33c   :  { %809 = vmatprep.subr.mxu0 %v1779_v11 }
 0x33d   :  { %810 = vmatpush1.msra.mxu0 %v1785_v12 }
 0x33e   :  { %811 = vmatprep.subr.mxu0 %v1791_v13 }
 0x33f   :  { %812 = vmatpush1.msra.mxu0 %v1797_v14  ;;  %v60_v47 = vpop.xlane.xlu1 %59 }
 0x340   :  { %v61_v48 = vmul.f32 0.0625, %v60_v47  ;;  %813 = vmatprep.subr.mxu0 %v1803_v15  ;;  %v942_v47 = vld [vmem:[%s2700_s8 + $0x228] sm:$0xff] }
 0x341   :  { %814 = vmatpush1.msra.mxu0 %v1809_v16 }
 0x342   :  { %v62_v49 = vadd.f32 1e-08, %v61_v48  ;;  %815 = vmatprep.subr.mxu0 %v1815_v17  ;;  %v876_v48 = vld [vmem:[%s2700_s8 + $0x18] sm:$0xff] }
 0x343   :  { %816 = vmatpush1.msra.mxu0 %v1821_v18 }
 0x344   :  { %1502 = vrsqrt.f32 %v62_v49  ;;  %817 = vmatprep.subr.mxu0 %v1827_v19 }
 0x345   :  { %818 = vmatpush1.msra.mxu0 %v1833_v20 }
 0x346   :  { %819 = vmatprep.subr.mxu0 %v1839_v21 }
 0x347   :  { %820 = vmatpush1.msra.mxu0 %v1845_v22 }
 0x348   :  { %854 = vmatmul.mubr.f32.vlgmr.msra.gmra.mxu0 %v1416_v50  ;;  %v875_v50 = vld [vmem:[%s2700_s8 + $0x10] sm:$0xff] }
 0x351   :  { %v1503_v53 = vpop.eup %1502 }
 0x352   :  { %v1970_v23 = vmul.f32 %v1503_v53, %v62_v49  ;;  %v66_v25 = vmul.f32 %v1503_v53, %v65_v52  ;;  %v941_v49 = vld [vmem:[%s2700_s8 + $0x220] sm:$0xff]  ;;  %v874_v52 = vld [vmem:[%s2700_s8 + $0x8] sm:$0xff]  ;;  %v939_v53 = vld [vmem:[%s2700_s8 + $0x210] sm:$0xff] }
 0x354   :  { %616 = vmatmul.mubr.f32.vlgmr.msra.gmra.mxu1 %v66_v25  ;;  %v873_v25 = vld [vmem:[%s2700_s8] sm:$0xff] }
 0x355   :  { %707 = vmatpush1.msra.mxu1 %v1665_v54  ;;  %770 = vmatprep.mubr.f32.mxu1 %v1527_v2  ;;  %v968_v2 = vld [vmem:[%s2700_s8 + $0x2f8] sm:$0xff]  ;;  %v967_v54 = vld [vmem:[%s2700_s8 + $0x2f0] sm:$0xff] }
 0x356   :  { %708 = vmatprep.subr.mxu1 %v1671_v55  ;;  %1136 = vmatprep.subr.mxu0 %v968_v2  ;;  %v966_v55 = vld [vmem:[%s2700_s8 + $0x2e8] sm:$0xff] }
 0x357   :  { %709 = vmatpush1.msra.mxu1 %v1677_v56  ;;  %1137 = vmatpush1.msra.mxu0 %v967_v54  ;;  %v965_v56 = vld [vmem:[%s2700_s8 + $0x2e0] sm:$0xff]  ;;  %v938_v2 = vld [vmem:[%s2700_s8 + $0x208] sm:$0xff]  ;;  %v936_v54 = vld [vmem:[%s2700_s8 + $0x1f8] sm:$0xff] }
 0x358   :  { %710 = vmatprep.subr.mxu1 %v1683_v57  ;;  %1138 = vmatprep.subr.mxu0 %v966_v55  ;;  %v964_v57 = vld [vmem:[%s2700_s8 + $0x2d8] sm:$0xff]  ;;  %v937_v55 = vld [vmem:[%s2700_s8 + $0x200] sm:$0xff] }
 0x359   :  { %711 = vmatpush1.msra.mxu1 %v1689_v58  ;;  %1139 = vmatpush1.msra.mxu0 %v965_v56  ;;  %v963_v58 = vld [vmem:[%s2700_s8 + $0x2d0] sm:$0xff] }
 0x35a   :  { %712 = vmatprep.subr.mxu1 %v1695_v59  ;;  %v962_v59 = vld [vmem:[%s2700_s8 + $0x2c8] sm:$0xff]  ;;  %1140 = vmatprep.subr.mxu0 %v964_v57  ;;  %v935_v56 = vld [vmem:[%s2700_s8 + $0x1f0] sm:$0xff]  ;;  %v1000_v57 = vld [vmem:[%s2700_s8 + $0x3f8] sm:$0xff] }
 0x35b   :  { %713 = vmatpush1.msra.mxu1 %v1701_v60  ;;  %v961_v60 = vld [vmem:[%s2700_s8 + $0x2c0] sm:$0xff]  ;;  %1141 = vmatpush1.msra.mxu0 %v963_v58  ;;  %v934_v58 = vld [vmem:[%s2700_s8 + $0x1e8] sm:$0xff] }
 0x35c   :  { %714 = vmatprep.subr.mxu1 %v1707_v61  ;;  %v1415_v61 = vld [vmem:[%s2694_s2 + $0x8] sm:$0xff]  ;;  %1142 = vmatprep.subr.mxu0 %v962_v59  ;;  %v999_v59 = vld [vmem:[%s2700_s8 + $0x3f0] sm:$0xff] }
 0x35d   :  { %715 = vmatpush1.msra.mxu1 %v1713_v62  ;;  %v904_v62 = vld [vmem:[%s2700_s8 + $0xf8] sm:$0xff]  ;;  %1143 = vmatpush1.msra.mxu0 %v961_v60  ;;  %v933_v60 = vld [vmem:[%s2700_s8 + $0x1e0] sm:$0xff] }
 0x35e   :  { %716 = vmatprep.subr.mxu1 %v1719_v63  ;;  %v903_v63 = vld [vmem:[%s2700_s8 + $0xf0] sm:$0xff] }
 0x35f   :  { %717 = vmatpush1.msra.mxu1 %v1725_v0  ;;  %v960_v0 = vld [vmem:[%s2700_s8 + $0x2b8] sm:$0xff] }
 0x360   :  { %718 = vmatprep.subr.mxu1 %v1731_v1  ;;  %v902_v1 = vld [vmem:[%s2700_s8 + $0xe8] sm:$0xff]  ;;  %1144 = vmatprep.subr.mxu0 %v960_v0  ;;  %v931_v0 = vld [vmem:[%s2700_s8 + $0x1d0] sm:$0xff] }
 0x361   :  { %719 = vmatpush1.msra.mxu1 %v1737_v3  ;;  %v959_v3 = vld [vmem:[%s2700_s8 + $0x2b0] sm:$0xff] }
 0x362   :  { %720 = vmatprep.subr.mxu1 %v1743_v5  ;;  %v901_v5 = vld [vmem:[%s2700_s8 + $0xe0] sm:$0xff]  ;;  %1145 = vmatpush1.msra.mxu0 %v959_v3  ;;  %v930_v3 = vld [vmem:[%s2700_s8 + $0x1c8] sm:$0xff] }
 0x363   :  { %721 = vmatpush1.msra.mxu1 %v1749_v6  ;;  %v900_v6 = vld [vmem:[%s2700_s8 + $0xd8] sm:$0xff] }
 0x364   :  { %722 = vmatprep.subr.mxu1 %v1755_v7  ;;  %v899_v7 = vld [vmem:[%s2700_s8 + $0xd0] sm:$0xff] }
 0x365   :  { %723 = vmatpush1.msra.mxu1 %v1761_v8  ;;  %v898_v8 = vld [vmem:[%s2700_s8 + $0xc8] sm:$0xff] }
 0x366   :  { %724 = vmatprep.subr.mxu1 %v1767_v9  ;;  %v897_v9 = vld [vmem:[%s2700_s8 + $0xc0] sm:$0xff] }
 0x367   :  { %725 = vmatpush1.msra.mxu1 %v1773_v10  ;;  %v896_v10 = vld [vmem:[%s2700_s8 + $0xb8] sm:$0xff] }
 0x368   :  { %726 = vmatprep.subr.mxu1 %v1779_v11  ;;  %v895_v11 = vld [vmem:[%s2700_s8 + $0xb0] sm:$0xff] }
 0x369   :  { %727 = vmatpush1.msra.mxu1 %v1785_v12  ;;  %v894_v12 = vld [vmem:[%s2700_s8 + $0xa8] sm:$0xff] }
 0x36a   :  { %728 = vmatprep.subr.mxu1 %v1791_v13  ;;  %v893_v13 = vld [vmem:[%s2700_s8 + $0xa0] sm:$0xff] }
 0x36b   :  { %729 = vmatpush1.msra.mxu1 %v1797_v14  ;;  %v958_v14 = vld [vmem:[%s2700_s8 + $0x2a8] sm:$0xff] }
 0x36c   :  { %730 = vmatprep.subr.mxu1 %v1803_v15  ;;  %1146 = vmatprep.subr.mxu0 %v958_v14  ;;  %v892_v15 = vld [vmem:[%s2700_s8 + $0x98] sm:$0xff]  ;;  %v925_v14 = vld [vmem:[%s2700_s8 + $0x1a0] sm:$0xff] }
 0x36d   :  { %731 = vmatpush1.msra.mxu1 %v1809_v16  ;;  %v957_v16 = vld [vmem:[%s2700_s8 + $0x2a0] sm:$0xff] }
 0x36e   :  { %732 = vmatprep.subr.mxu1 %v1815_v17  ;;  %1147 = vmatpush1.msra.mxu0 %v957_v16  ;;  %v891_v17 = vld [vmem:[%s2700_s8 + $0x90] sm:$0xff]  ;;  %v924_v16 = vld [vmem:[%s2700_s8 + $0x198] sm:$0xff] }
 0x36f   :  { %733 = vmatpush1.msra.mxu1 %v1821_v18  ;;  %v956_v18 = vld [vmem:[%s2700_s8 + $0x298] sm:$0xff] }
 0x370   :  { %734 = vmatprep.subr.mxu1 %v1827_v19  ;;  %1148 = vmatprep.subr.mxu0 %v956_v18  ;;  %v890_v19 = vld [vmem:[%s2700_s8 + $0x88] sm:$0xff]  ;;  %v923_v18 = vld [vmem:[%s2700_s8 + $0x190] sm:$0xff] }
 0x371   :  { %735 = vmatpush1.msra.mxu1 %v1833_v20  ;;  %v955_v20 = vld [vmem:[%s2700_s8 + $0x290] sm:$0xff] }
 0x372   :  { %736 = vmatprep.subr.mxu1 %v1839_v21  ;;  %1149 = vmatpush1.msra.mxu0 %v955_v20  ;;  %v889_v21 = vld [vmem:[%s2700_s8 + $0x80] sm:$0xff]  ;;  %v922_v20 = vld [vmem:[%s2700_s8 + $0x188] sm:$0xff] }
 0x373   :  { %737 = vmatpush1.msra.mxu1 %v1845_v22  ;;  %v954_v22 = vld [vmem:[%s2700_s8 + $0x288] sm:$0xff] }
 0x374   :  { %771 = vmatmul.mubr.f32.vlgmr.msra.gmra.mxu1 %v1415_v61  ;;  %1065 = vmatprep.subr.mxu1 %v904_v62  ;;  %v998_v61 = vld [vmem:[%s2700_s8 + $0x3e8] sm:$0xff]  ;;  %v932_v62 = vld [vmem:[%s2700_s8 + $0x1d8] sm:$0xff] }
 0x375   :  { %1066 = vmatpush1.msra.mxu1 %v903_v63  ;;  %1150 = vmatprep.subr.mxu0 %v954_v22  ;;  %v997_v63 = vld [vmem:[%s2700_s8 + $0x3e0] sm:$0xff] }
 0x376   :  { %1067 = vmatprep.subr.mxu1 %v902_v1  ;;  %1151 = vmatpush1.msra.mxu0 %v953_v26  ;;  %v996_v1 = vld [vmem:[%s2700_s8 + $0x3d8] sm:$0xff]  ;;  %v921_v22 = vld [vmem:[%s2700_s8 + $0x180] sm:$0xff] }
 0x377   :  { %1068 = vmatpush1.msra.mxu1 %v901_v5  ;;  %1152 = vmatprep.subr.mxu0 %v952_v28  ;;  %v995_v5 = vld [vmem:[%s2700_s8 + $0x3d0] sm:$0xff]  ;;  %v920_v26 = vld [vmem:[%s2700_s8 + $0x178] sm:$0xff] }
 0x378   :  { %1069 = vmatprep.subr.mxu1 %v900_v6  ;;  %1153 = vmatpush1.msra.mxu0 %v951_v30  ;;  %v929_v6 = vld [vmem:[%s2700_s8 + $0x1c0] sm:$0xff]  ;;  %v919_v28 = vld [vmem:[%s2700_s8 + $0x170] sm:$0xff]  ;;  %v918_v30 = vld [vmem:[%s2700_s8 + $0x168] sm:$0xff] }
 0x379   :  { %1070 = vmatpush1.msra.mxu1 %v899_v7  ;;  %1154 = vmatprep.subr.mxu0 %v950_v32  ;;  %v994_v7 = vld [vmem:[%s2700_s8 + $0x3c8] sm:$0xff]  ;;  %v917_v32 = vld [vmem:[%s2700_s8 + $0x160] sm:$0xff] }
 0x37a   :  { %1071 = vmatprep.subr.mxu1 %v898_v8  ;;  %1155 = vmatpush1.msra.mxu0 %v949_v34  ;;  %v928_v8 = vld [vmem:[%s2700_s8 + $0x1b8] sm:$0xff] }
 0x37b   :  { %1072 = vmatpush1.msra.mxu1 %v897_v9  ;;  %1156 = vmatprep.subr.mxu0 %v948_v36  ;;  %v993_v9 = vld [vmem:[%s2700_s8 + $0x3c0] sm:$0xff]  ;;  %v916_v34 = vld [vmem:[%s2700_s8 + $0x158] sm:$0xff]  ;;  %v915_v36 = vld [vmem:[%s2700_s8 + $0x150] sm:$0xff] }
 0x37c   :  { %1073 = vmatprep.subr.mxu1 %v896_v10  ;;  %1157 = vmatpush1.msra.mxu0 %v947_v37  ;;  %v927_v10 = vld [vmem:[%s2700_s8 + $0x1b0] sm:$0xff]  ;;  %v914_v37 = vld [vmem:[%s2700_s8 + $0x148] sm:$0xff] }
 0x37d   :  { %1074 = vmatpush1.msra.mxu1 %v895_v11  ;;  %1158 = vmatprep.subr.mxu0 %v946_v39  ;;  %v992_v11 = vld [vmem:[%s2700_s8 + $0x3b8] sm:$0xff]  ;;  %v913_v39 = vld [vmem:[%s2700_s8 + $0x140] sm:$0xff] }
 0x37e   :  { %1075 = vmatprep.subr.mxu1 %v894_v12  ;;  %1159 = vmatpush1.msra.mxu0 %v945_v41  ;;  %v926_v12 = vld [vmem:[%s2700_s8 + $0x1a8] sm:$0xff]  ;;  %v912_v41 = vld [vmem:[%s2700_s8 + $0x138] sm:$0xff] }
 0x37f   :  { %1076 = vmatpush1.msra.mxu1 %v893_v13  ;;  %1160 = vmatprep.subr.mxu0 %v944_v43  ;;  %v991_v13 = vld [vmem:[%s2700_s8 + $0x3b0] sm:$0xff] }
 0x380   :  { %1077 = vmatprep.subr.mxu1 %v892_v15  ;;  %1161 = vmatpush1.msra.mxu0 %v943_v45  ;;  %v990_v15 = vld [vmem:[%s2700_s8 + $0x3a8] sm:$0xff]  ;;  %v911_v43 = vld [vmem:[%s2700_s8 + $0x130] sm:$0xff] }
 0x381   :  { %1078 = vmatpush1.msra.mxu1 %v891_v17  ;;  %1162 = vmatprep.subr.mxu0 %v942_v47  ;;  %v989_v17 = vld [vmem:[%s2700_s8 + $0x3a0] sm:$0xff]  ;;  %v910_v45 = vld [vmem:[%s2700_s8 + $0x128] sm:$0xff] }
 0x382   :  { %1079 = vmatprep.subr.mxu1 %v890_v19  ;;  %1163 = vmatpush1.msra.mxu0 %v941_v49  ;;  %v988_v19 = vld [vmem:[%s2700_s8 + $0x398] sm:$0xff]  ;;  %v909_v47 = vld [vmem:[%s2700_s8 + $0x120] sm:$0xff] }
 0x383   :  { %1080 = vmatpush1.msra.mxu1 %v889_v21  ;;  %1164 = vmatprep.subr.mxu0 %v940_v51  ;;  %v987_v21 = vld [vmem:[%s2700_s8 + $0x390] sm:$0xff]  ;;  %v908_v49 = vld [vmem:[%s2700_s8 + $0x118] sm:$0xff] }
 0x384   :  { %1081 = vmatprep.subr.mxu1 %v888_v24  ;;  %1165 = vmatpush1.msra.mxu0 %v939_v53  ;;  %v986_v24 = vld [vmem:[%s2700_s8 + $0x388] sm:$0xff]  ;;  %v907_v51 = vld [vmem:[%s2700_s8 + $0x110] sm:$0xff] }
 0x385   :  { %1082 = vmatpush1.msra.mxu1 %v887_v27  ;;  %1166 = vmatprep.subr.mxu0 %v938_v2  ;;  %v985_v27 = vld [vmem:[%s2700_s8 + $0x380] sm:$0xff]  ;;  %v906_v53 = vld [vmem:[%s2700_s8 + $0x108] sm:$0xff] }
 0x386   :  { %1083 = vmatprep.subr.mxu1 %v886_v29  ;;  %1167 = vmatpush1.msra.mxu0 %v937_v55  ;;  %v984_v29 = vld [vmem:[%s2700_s8 + $0x378] sm:$0xff]  ;;  %v905_v2 = vld [vmem:[%s2700_s8 + $0x100] sm:$0xff] }
 0x387   :  { %1084 = vmatpush1.msra.mxu1 %v885_v31  ;;  %1168 = vmatprep.subr.mxu0 %v1000_v57  ;;  %v983_v31 = vld [vmem:[%s2700_s8 + $0x370] sm:$0xff]  ;;  %v1032_v57 = vld [vmem:[%s2700_s8 + $0x4f8] sm:$0xff] }
 0x388   :  { %1085 = vmatprep.subr.mxu1 %v884_v33  ;;  %1169 = vmatpush2.msra.mxu0 %v999_v59  ;;  %v982_v33 = vld [vmem:[%s2700_s8 + $0x368] sm:$0xff] }
 0x389   :  { %1086 = vmatpush1.msra.mxu1 %v883_v35  ;;  %1170 = vmatprep.subr.mxu0 %v998_v61  ;;  %v981_v35 = vld [vmem:[%s2700_s8 + $0x360] sm:$0xff] }
 0x38a   :  { %1087 = vmatprep.subr.mxu1 %v882_v4  ;;  %1171 = vmatpush2.msra.mxu0 %v997_v63  ;;  %v980_v4 = vld [vmem:[%s2700_s8 + $0x358] sm:$0xff] }
 0x38b   :  { %1088 = vmatpush1.msra.mxu1 %v881_v38  ;;  %1172 = vmatprep.subr.mxu0 %v996_v1  ;;  %v979_v38 = vld [vmem:[%s2700_s8 + $0x350] sm:$0xff] }
 0x38c   :  { %1089 = vmatprep.subr.mxu1 %v880_v40  ;;  %1173 = vmatpush2.msra.mxu0 %v995_v5  ;;  %v978_v40 = vld [vmem:[%s2700_s8 + $0x348] sm:$0xff] }
 0x38d   :  { %1090 = vmatpush1.msra.mxu1 %v879_v42  ;;  %1174 = vmatprep.subr.mxu0 %v994_v7  ;;  %v977_v42 = vld [vmem:[%s2700_s8 + $0x340] sm:$0xff] }
 0x38e   :  { %1091 = vmatprep.subr.mxu1 %v878_v44  ;;  %1175 = vmatpush2.msra.mxu0 %v993_v9  ;;  %v976_v44 = vld [vmem:[%s2700_s8 + $0x338] sm:$0xff] }
 0x38f   :  { %1092 = vmatpush1.msra.mxu1 %v877_v46  ;;  %1176 = vmatprep.subr.mxu0 %v992_v11  ;;  %v975_v46 = vld [vmem:[%s2700_s8 + $0x330] sm:$0xff] }
 0x390   :  { %1093 = vmatprep.subr.mxu1 %v876_v48  ;;  %1177 = vmatpush2.msra.mxu0 %v991_v13  ;;  %v974_v48 = vld [vmem:[%s2700_s8 + $0x328] sm:$0xff] }
 0x391   :  { %1094 = vmatpush1.msra.mxu1 %v875_v50  ;;  %1178 = vmatprep.subr.mxu0 %v990_v15  ;;  %v973_v50 = vld [vmem:[%s2700_s8 + $0x320] sm:$0xff] }
 0x392   :  { %1095 = vmatprep.subr.mxu1 %v874_v52  ;;  %1179 = vmatpush2.msra.mxu0 %v989_v17  ;;  %v972_v52 = vld [vmem:[%s2700_s8 + $0x318] sm:$0xff] }
 0x393   :  { %1096 = vmatpush1.msra.mxu1 %v873_v25  ;;  %1180 = vmatprep.subr.mxu0 %v988_v19  ;;  %v971_v25 = vld [vmem:[%s2700_s8 + $0x310] sm:$0xff] }
 0x394   :  { %1097 = vmatprep.subr.mxu1 %v936_v54  ;;  %1181 = vmatpush2.msra.mxu0 %v987_v21  ;;  %v970_v54 = vld [vmem:[%s2700_s8 + $0x308] sm:$0xff] }
 0x395   :  { %1098 = vmatpush2.msra.mxu1 %v935_v56  ;;  %1182 = vmatprep.subr.mxu0 %v986_v24  ;;  %v969_v56 = vld [vmem:[%s2700_s8 + $0x300] sm:$0xff] }
 0x396   :  { %1099 = vmatprep.subr.mxu1 %v934_v58  ;;  %1183 = vmatpush2.msra.mxu0 %v985_v27 }
 0x397   :  { %1100 = vmatpush2.msra.mxu1 %v933_v60  ;;  %1184 = vmatprep.subr.mxu0 %v984_v29 }
 0x398   :  { %1101 = vmatprep.subr.mxu1 %v932_v62  ;;  %1185 = vmatpush2.msra.mxu0 %v983_v31 }
 0x399   :  { %1102 = vmatpush2.msra.mxu1 %v931_v0  ;;  %1186 = vmatprep.subr.mxu0 %v982_v33 }
 0x39a   :  { %1103 = vmatprep.subr.mxu1 %v930_v3  ;;  %1187 = vmatpush2.msra.mxu0 %v981_v35 }
 0x39b   :  { %1104 = vmatpush2.msra.mxu1 %v929_v6  ;;  %1188 = vmatprep.subr.mxu0 %v980_v4 }
 0x39c   :  { %1105 = vmatprep.subr.mxu1 %v928_v8  ;;  %1189 = vmatpush2.msra.mxu0 %v979_v38  ;;  %v1031_v38 = vld [vmem:[%s2700_s8 + $0x4f0] sm:$0xff] }
 0x39d   :  { %1106 = vmatpush2.msra.mxu1 %v927_v10  ;;  %1190 = vmatprep.subr.mxu0 %v978_v40 }
 0x39e   :  { %1107 = vmatprep.subr.mxu1 %v926_v12  ;;  %1191 = vmatpush2.msra.mxu0 %v977_v42  ;;  %v1029_v42 = vld [vmem:[%s2700_s8 + $0x4e0] sm:$0xff] }
 0x39f   :  { %1108 = vmatpush2.msra.mxu1 %v925_v14  ;;  %1192 = vmatprep.subr.mxu0 %v976_v44  ;;  %v1027_v44 = vld [vmem:[%s2700_s8 + $0x4d0] sm:$0xff] }
 0x3a0   :  { %1109 = vmatprep.subr.mxu1 %v924_v16  ;;  %1193 = vmatpush2.msra.mxu0 %v975_v46  ;;  %v1025_v46 = vld [vmem:[%s2700_s8 + $0x4c0] sm:$0xff] }
 0x3a1   :  { %1110 = vmatpush2.msra.mxu1 %v923_v18  ;;  %1194 = vmatprep.subr.mxu0 %v974_v48  ;;  %v1023_v48 = vld [vmem:[%s2700_s8 + $0x4b0] sm:$0xff] }
 0x3a2   :  { %1111 = vmatprep.subr.mxu1 %v922_v20  ;;  %1195 = vmatpush2.msra.mxu0 %v973_v50  ;;  %v1021_v50 = vld [vmem:[%s2700_s8 + $0x4a0] sm:$0xff] }
 0x3a3   :  { %1112 = vmatpush2.msra.mxu1 %v921_v22  ;;  %1196 = vmatprep.subr.mxu0 %v972_v52  ;;  %v1019_v52 = vld [vmem:[%s2700_s8 + $0x490] sm:$0xff] }
 0x3a4   :  { %1113 = vmatprep.subr.mxu1 %v920_v26  ;;  %1197 = vmatpush2.msra.mxu0 %v971_v25  ;;  %v1017_v25 = vld [vmem:[%s2700_s8 + $0x480] sm:$0xff] }
 0x3a5   :  { %1114 = vmatpush2.msra.mxu1 %v919_v28  ;;  %1198 = vmatprep.subr.mxu0 %v970_v54  ;;  %v1015_v54 = vld [vmem:[%s2700_s8 + $0x470] sm:$0xff] }
 0x3a6   :  { %1115 = vmatprep.subr.mxu1 %v918_v30  ;;  %1199 = vmatpush2.msra.mxu0 %v969_v56  ;;  %v1013_v56 = vld [vmem:[%s2700_s8 + $0x460] sm:$0xff] }
 0x3a7   :  { %1116 = vmatpush2.msra.mxu1 %v917_v32 }
 0x3a8   :  { %1117 = vmatprep.subr.mxu1 %v916_v34 }
 0x3a9   :  { %1118 = vmatpush2.msra.mxu1 %v915_v36 }
 0x3aa   :  { %1119 = vmatprep.subr.mxu1 %v914_v37 }
 0x3ab   :  { %1120 = vmatpush2.msra.mxu1 %v913_v39  ;;  %v1030_v39 = vld [vmem:[%s2700_s8 + $0x4e8] sm:$0xff] }
 0x3ac   :  { %1121 = vmatprep.subr.mxu1 %v912_v41 }
 0x3ad   :  { %1122 = vmatpush2.msra.mxu1 %v911_v43  ;;  %v1028_v43 = vld [vmem:[%s2700_s8 + $0x4d8] sm:$0xff] }
 0x3ae   :  { %1123 = vmatprep.subr.mxu1 %v910_v45  ;;  %v1026_v45 = vld [vmem:[%s2700_s8 + $0x4c8] sm:$0xff] }
 0x3af   :  { %1124 = vmatpush2.msra.mxu1 %v909_v47  ;;  %v1024_v47 = vld [vmem:[%s2700_s8 + $0x4b8] sm:$0xff] }
 0x3b0   :  { %1125 = vmatprep.subr.mxu1 %v908_v49  ;;  %v1022_v49 = vld [vmem:[%s2700_s8 + $0x4a8] sm:$0xff] }
 0x3b1   :  { %1126 = vmatpush2.msra.mxu1 %v907_v51  ;;  %v1020_v51 = vld [vmem:[%s2700_s8 + $0x498] sm:$0xff] }
 0x3b2   :  { %1127 = vmatprep.subr.mxu1 %v906_v53  ;;  %v1018_v53 = vld [vmem:[%s2700_s8 + $0x488] sm:$0xff] }
 0x3b3   :  { %1128 = vmatpush2.msra.mxu1 %v905_v2  ;;  %v1016_v2 = vld [vmem:[%s2700_s8 + $0x478] sm:$0xff] }
 0x3b4   :  { %1207 = vmatprep.subr.mxu1 %v1032_v57  ;;  %v1012_v57 = vld [vmem:[%s2700_s8 + $0x458] sm:$0xff] }
 0x3bc   :  { %v302_v55 = vpop.f32.mrf.mxu0 }
 0x3be   :  { %v304_v58 = vpop.f32.mrf.mxu0 }
 0x3c0   :  { %v373_v59 = vpop.f32.mrf.mxu0 }
 0x3c2   :  { %v375_v60 = vpop.f32.mrf.mxu0 }
 0x3c4   :  { %v444_v61 = vpop.f32.mrf.mxu0 }
 0x3c6   :  { %v446_v62 = vpop.f32.mrf.mxu0 }
 0x3c8   :  { %v515_v63 = vpop.f32.mrf.mxu0 }
 0x3ca   :  { %v1471_v0 = vpop.f32.mrf.mxu0 }
 0x3cb   :  { %v1005_v0 = vld [vmem:[%s2700_s8 + $0x420] sm:$0xff] }
 0x3e8   :  { %v689_v1 = vpop.f32.mrf.mxu0 }
 0x3e9   :  { %v694_v15 = vmul.f32 %v689_v1, %v302_v55 }
 0x3ea   :  { %v691_v5 = vpop.f32.mrf.mxu0 }
 0x3eb   :  { %v696_v16 = vmul.f32 %v691_v5, %v302_v55  ;;  %v1014_v55 = vld [vmem:[%s2700_s8 + $0x468] sm:$0xff] }
 0x408   :  { %v855_v8 = vpop.f32.mrf.mxu0 }
 0x409   :  { %v860_v32 = vmul.f32 %v855_v8, %v373_v59 }
 0x40a   :  { %v857_v12 = vpop.f32.mrf.mxu0 }
 0x40b   :  { %v862_v24 = vmul.f32 %v857_v12, %v373_v59  ;;  %v1010_v59 = vld [vmem:[%s2700_s8 + $0x448] sm:$0xff] }
 0x414   :  { %v617_v3 = vpop.f32.mrf.mxu1 }
 0x415   :  { %v698_v9 = vsub.f32 %v689_v1, %v617_v3  ;;  %v864_v10 = vsub.f32 %v855_v8, %v617_v3  ;;  %v870_v4 = vmul.f32 %v617_v3, %v515_v63  ;;  %v1004_v1 = vld [vmem:[%s2700_s8 + $0x418] sm:$0xff]  ;;  %v1063_v8 = vld [vmem:[%s2700_s8 + $0x5f0] sm:$0xff] }
 0x416   :  { %v619_v6 = vpop.f32.mrf.mxu1 }
 0x417   :  { %v701_v7 = vsub.f32 %v691_v5, %v619_v6  ;;  %v867_v17 = vsub.f32 %v857_v12, %v619_v6  ;;  %v699_v19 = vmul.f32 %v698_v9, %v375_v60  ;;  %v865_v27 = vmul.f32 %v864_v10, %v446_v62  ;;  %v1002_v5 = vld [vmem:[%s2700_s8 + $0x408] sm:$0xff]  ;;  %v1061_v10 = vld [vmem:[%s2700_s8 + $0x5e0] sm:$0xff]  ;;  %v1059_v12 = vld [vmem:[%s2700_s8 + $0x5d0] sm:$0xff] }
 0x418   :  { %v871_v40 = vmul.f32 %v619_v6, %v515_v63  ;;  %v1006_v63 = vld [vmem:[%s2700_s8 + $0x428] sm:$0xff] }
 0x419   :  { %v702_v29 = vmul.f32 %v701_v7, %v375_v60  ;;  %v868_v33 = vmul.f32 %v867_v17, %v446_v62  ;;  %v1009_v60 = vld [vmem:[%s2700_s8 + $0x440] sm:$0xff]  ;;  %v1007_v62 = vld [vmem:[%s2700_s8 + $0x430] sm:$0xff]  ;;  %v1064_v7 = vld [vmem:[%s2700_s8 + $0x5f8] sm:$0xff] }
 0x41a   :  { %v1062_v9 = vld [vmem:[%s2700_s8 + $0x5e8] sm:$0xff] }
 0x41b   :  { %v1054_v17 = vld [vmem:[%s2700_s8 + $0x5a8] sm:$0xff] }
 0x434   :  { %v772_v11 = vpop.f32.mrf.mxu1 }
 0x435   :  { %v777_v13 = vmul.f32 %v772_v11, %v304_v58  ;;  %v781_v14 = vsub.f32 %v772_v11, %v617_v3  ;;  %v1003_v3 = vld [vmem:[%s2700_s8 + $0x410] sm:$0xff]  ;;  %v1060_v11 = vld [vmem:[%s2700_s8 + $0x5d8] sm:$0xff] }
 0x436   :  { %v774_v18 = vpop.f32.mrf.mxu1 }
 0x437   :  { %v782_v20 = vmul.f32 %v781_v14, %v444_v61  ;;  %v779_v21 = vmul.f32 %v774_v18, %v304_v58  ;;  %v784_v22 = vsub.f32 %v774_v18, %v619_v6  ;;  %v778_v26 = vadd.f32 %v777_v13, %v694_v15  ;;  %v1011_v58 = vld [vmem:[%s2700_s8 + $0x450] sm:$0xff]  ;;  %v1001_v6 = vld [vmem:[%s2700_s8 + $0x400] sm:$0xff]  ;;  %v1058_v13 = vld [vmem:[%s2700_s8 + $0x5c8] sm:$0xff] }
 0x438   :  { %v1057_v14 = vld [vmem:[%s2700_s8 + $0x5c0] sm:$0xff]  ;;  %v1056_v15 = vld [vmem:[%s2700_s8 + $0x5b8] sm:$0xff] }
 0x439   :  { %v783_v28 = vadd.f32 %v782_v20, %v699_v19  ;;  %v780_v30 = vadd.f32 %v779_v21, %v696_v16  ;;  %v785_v31 = vmul.f32 %v784_v22, %v444_v61  ;;  %v861_v37 = vadd.f32 %v860_v32, %v778_v26  ;;  %v1008_v61 = vld [vmem:[%s2700_s8 + $0x438] sm:$0xff]  ;;  %v1055_v16 = vld [vmem:[%s2700_s8 + $0x5b0] sm:$0xff]  ;;  %v1053_v18 = vld [vmem:[%s2700_s8 + $0x5a0] sm:$0xff] }
 0x43a   :  { %v1052_v19 = vld [vmem:[%s2700_s8 + $0x598] sm:$0xff]  ;;  %v1051_v20 = vld [vmem:[%s2700_s8 + $0x590] sm:$0xff]  ;;  %v1050_v21 = vld [vmem:[%s2700_s8 + $0x588] sm:$0xff] }
 0x43b   :  { %v786_v34 = vadd.f32 %v785_v31, %v702_v29  ;;  %v866_v35 = vadd.f32 %v865_v27, %v783_v28  ;;  %v863_v36 = vadd.f32 %v862_v24, %v780_v30  ;;  %v1049_v22 = vld [vmem:[%s2700_s8 + $0x580] sm:$0xff]  ;;  %v1048_v24 = vld [vmem:[%s2700_s8 + $0x578] sm:$0xff]  ;;  %v1047_v26 = vld [vmem:[%s2700_s8 + $0x570] sm:$0xff] }
 0x43c   :  { %v1046_v27 = vld [vmem:[%s2700_s8 + $0x568] sm:$0xff]  ;;  %v1045_v28 = vld [vmem:[%s2700_s8 + $0x560] sm:$0xff]  ;;  %v1044_v29 = vld [vmem:[%s2700_s8 + $0x558] sm:$0xff] }
 0x43d   :  { %1129 = vmatprep.mubr.f32.mxu1 %v866_v35  ;;  %1200 = vmatprep.mubr.f32.mxu0 %v863_v36  ;;  %v2400_v41 = vadd.f32 %v868_v33, %v786_v34  ;;  %v1043_v30 = vld [vmem:[%s2700_s8 + $0x550] sm:$0xff]  ;;  %v1042_v31 = vld [vmem:[%s2700_s8 + $0x548] sm:$0xff]  ;;  %v1041_v32 = vld [vmem:[%s2700_s8 + $0x540] sm:$0xff] }
 0x43e   :  { %1130 = vmatmul.mubr.f32.vlgmr.msra.gmra.mxu1 %v861_v37  ;;  %1201 = vmatmul.mubr.f32.vlgmr.msra.gmra.mxu0 %v870_v4  ;;  %v1040_v33 = vld [vmem:[%s2700_s8 + $0x538] sm:$0xff]  ;;  %v1039_v34 = vld [vmem:[%s2700_s8 + $0x530] sm:$0xff]  ;;  %v1038_v35 = vld [vmem:[%s2700_s8 + $0x528] sm:$0xff] }
 0x43f   :  { %1208 = vmatpush1.msra.mxu1 %v1031_v38  ;;  %1271 = vmatprep.mubr.f32.mxu1 %v871_v40  ;;  %v1037_v36 = vld [vmem:[%s2700_s8 + $0x520] sm:$0xff]  ;;  %v1036_v4 = vld [vmem:[%s2700_s8 + $0x518] sm:$0xff]  ;;  %v1035_v37 = vld [vmem:[%s2700_s8 + $0x510] sm:$0xff] }
 0x440   :  { %1209 = vmatprep.subr.mxu1 %v1030_v39  ;;  %v1034_v38 = vld [vmem:[%s2700_s8 + $0x508] sm:$0xff]  ;;  %v1033_v39 = vld [vmem:[%s2700_s8 + $0x500] sm:$0xff]  ;;  %v1322_v40 = vld [vmem:[%s2702_s10 + $0xf8] sm:$0xff] }
 0x441   :  { %1210 = vmatpush1.msra.mxu1 %v1029_v42  ;;  %v1306_v42 = vld [vmem:[%s2702_s10 + $0x78] sm:$0xff]  ;;  %1423 = vmatprep.subr.mxu0 %v1322_v40 }
 0x442   :  { %1211 = vmatprep.subr.mxu1 %v1028_v43  ;;  %v1321_v43 = vld [vmem:[%s2702_s10 + $0xf0] sm:$0xff]  ;;  %1424 = vmatpush3.msra.mxu0 %v1306_v42 }
 0x443   :  { %1212 = vmatpush1.msra.mxu1 %v1027_v44  ;;  %v1305_v44 = vld [vmem:[%s2702_s10 + $0x70] sm:$0xff]  ;;  %1425 = vmatprep.subr.mxu0 %v1321_v43 }
 0x444   :  { %1213 = vmatprep.subr.mxu1 %v1026_v45  ;;  %v1304_v45 = vld [vmem:[%s2702_s10 + $0x68] sm:$0xff]  ;;  %1426 = vmatpush3.msra.mxu0 %v1305_v44 }
 0x445   :  { %1214 = vmatpush1.msra.mxu1 %v1025_v46  ;;  %v1319_v46 = vld [vmem:[%s2702_s10 + $0xe0] sm:$0xff] }
 0x446   :  { %1215 = vmatprep.subr.mxu1 %v1024_v47  ;;  %v1303_v47 = vld [vmem:[%s2702_s10 + $0x60] sm:$0xff] }
 0x447   :  { %1216 = vmatpush1.msra.mxu1 %v1023_v48  ;;  %v1318_v48 = vld [vmem:[%s2702_s10 + $0xd8] sm:$0xff] }
 0x448   :  { %1217 = vmatprep.subr.mxu1 %v1022_v49  ;;  %v1302_v49 = vld [vmem:[%s2702_s10 + $0x58] sm:$0xff] }
 0x449   :  { %1218 = vmatpush1.msra.mxu1 %v1021_v50  ;;  %v1317_v50 = vld [vmem:[%s2702_s10 + $0xd0] sm:$0xff] }
 0x44a   :  { %1219 = vmatprep.subr.mxu1 %v1020_v51  ;;  %v1301_v51 = vld [vmem:[%s2702_s10 + $0x50] sm:$0xff] }
 0x44b   :  { %1220 = vmatpush1.msra.mxu1 %v1019_v52  ;;  %v1316_v52 = vld [vmem:[%s2702_s10 + $0xc8] sm:$0xff] }
 0x44c   :  { %1221 = vmatprep.subr.mxu1 %v1018_v53  ;;  %v1300_v53 = vld [vmem:[%s2702_s10 + $0x48] sm:$0xff] }
 0x44d   :  { %1222 = vmatpush1.msra.mxu1 %v1017_v25  ;;  %v1315_v25 = vld [vmem:[%s2702_s10 + $0xc0] sm:$0xff] }
 0x44e   :  { %1223 = vmatprep.subr.mxu1 %v1016_v2  ;;  %v1299_v2 = vld [vmem:[%s2702_s10 + $0x40] sm:$0xff] }
 0x44f   :  { %1224 = vmatpush1.msra.mxu1 %v1015_v54  ;;  %v1314_v54 = vld [vmem:[%s2702_s10 + $0xb8] sm:$0xff] }
 0x450   :  { %1225 = vmatprep.subr.mxu1 %v1014_v55  ;;  %v1298_v55 = vld [vmem:[%s2702_s10 + $0x38] sm:$0xff] }
 0x451   :  { %1226 = vmatpush1.msra.mxu1 %v1013_v56  ;;  %v1313_v56 = vld [vmem:[%s2702_s10 + $0xb0] sm:$0xff] }
 0x452   :  { %1227 = vmatprep.subr.mxu1 %v1012_v57  ;;  %v1297_v57 = vld [vmem:[%s2702_s10 + $0x30] sm:$0xff] }
 0x453   :  { %1228 = vmatpush1.msra.mxu1 %v1011_v58  ;;  %v1312_v58 = vld [vmem:[%s2702_s10 + $0xa8] sm:$0xff] }
 0x454   :  { %1229 = vmatprep.subr.mxu1 %v1010_v59  ;;  %v1296_v59 = vld [vmem:[%s2702_s10 + $0x28] sm:$0xff] }
 0x455   :  { %1230 = vmatpush1.msra.mxu1 %v1009_v60  ;;  %v1311_v60 = vld [vmem:[%s2702_s10 + $0xa0] sm:$0xff] }
 0x456   :  { %1231 = vmatprep.subr.mxu1 %v1008_v61  ;;  %v1295_v61 = vld [vmem:[%s2702_s10 + $0x20] sm:$0xff] }
 0x457   :  { %1232 = vmatpush1.msra.mxu1 %v1007_v62  ;;  %v1310_v62 = vld [vmem:[%s2702_s10 + $0x98] sm:$0xff] }
 0x458   :  { %1233 = vmatprep.subr.mxu1 %v1006_v63  ;;  %v1294_v63 = vld [vmem:[%s2702_s10 + $0x18] sm:$0xff] }
 0x459   :  { %1234 = vmatpush1.msra.mxu1 %v1005_v0  ;;  %v1309_v0 = vld [vmem:[%s2702_s10 + $0x90] sm:$0xff] }
 0x45a   :  { %1235 = vmatprep.subr.mxu1 %v1004_v1  ;;  %v1293_v1 = vld [vmem:[%s2702_s10 + $0x10] sm:$0xff] }
 0x45b   :  { %1236 = vmatpush1.msra.mxu1 %v1003_v3  ;;  %v1308_v3 = vld [vmem:[%s2702_s10 + $0x88] sm:$0xff] }
 0x45c   :  { %1237 = vmatprep.subr.mxu1 %v1002_v5  ;;  %v1292_v5 = vld [vmem:[%s2702_s10 + $0x8] sm:$0xff] }
 0x45d   :  { %1238 = vmatpush1.msra.mxu1 %v1001_v6  ;;  %v1307_v6 = vld [vmem:[%s2702_s10 + $0x80] sm:$0xff] }
 0x45e   :  { %1239 = vmatprep.subr.mxu1 %v1064_v7  ;;  %v1291_v7 = vld [vmem:[%s2702_s10] sm:$0xff] }
 0x45f   :  { %1240 = vmatpush2.msra.mxu1 %v1063_v8  ;;  %v1279_v8 = vlaneseq }
 0x460   :  { %1241 = vmatprep.subr.mxu1 %v1062_v9 }
 0x461   :  { %1242 = vmatpush2.msra.mxu1 %v1061_v10 }
 0x462   :  { %1243 = vmatprep.subr.mxu1 %v1060_v11  ;;  %v1280_v11 = vshrl.u32 %v1279_v8, 7 }
 0x463   :  { %1244 = vmatpush2.msra.mxu1 %v1059_v12 }
 0x464   :  { %1245 = vmatprep.subr.mxu1 %v1058_v13  ;;  %v1285_v12 = vsub.s32 1, %v1280_v11 }
 0x465   :  { %1246 = vmatpush2.msra.mxu1 %v1057_v14 }
 0x466   :  { %1247 = vmatprep.subr.mxu1 %v1056_v15  ;;  %v1281_v15 = vsub.s32 0, %v1280_v11 }
 0x467   :  { %1248 = vmatpush2.msra.mxu1 %v1055_v16  ;;  %v872_v16 = vld [vmem:[%s2701_s9] sm:$0x3] }
 0x468   :  { %1249 = vmatprep.subr.mxu1 %v1054_v17 }
 0x469   :  { %1250 = vmatpush2.msra.mxu1 %v1053_v18 }
 0x46a   :  { %1251 = vmatprep.subr.mxu1 %v1052_v19 }
 0x46b   :  { %1252 = vmatpush2.msra.mxu1 %v1051_v20  ;;  %v1286_v20 = vrot.slane %v872_v16, %v1285_v12 }
 0x46c   :  { %1253 = vmatprep.subr.mxu1 %v1050_v21 }
 0x46d   :  { %1254 = vmatpush2.msra.mxu1 %v1049_v22  ;;  %v1282_v22 = vrot.slane %v872_v16, %v1281_v15 }
 0x46e   :  { %1255 = vmatprep.subr.mxu1 %v1048_v24 }
 0x46f   :  { %1256 = vmatpush2.msra.mxu1 %v1047_v26 }
 0x470   :  { %1257 = vmatprep.subr.mxu1 %v1046_v27 }
 0x471   :  { %1258 = vmatpush2.msra.mxu1 %v1045_v28 }
 0x472   :  { %1259 = vmatprep.subr.mxu1 %v1044_v29 }
 0x473   :  { %1260 = vmatpush2.msra.mxu1 %v1043_v30 }
 0x474   :  { %1261 = vmatprep.subr.mxu1 %v1042_v31 }
 0x475   :  { %1262 = vmatpush2.msra.mxu1 %v1041_v32 }
 0x476   :  { %1263 = vmatprep.subr.mxu1 %v1040_v33  ;;  %v1504_v33 = vld [vmem:[%s2693_s1] sm:$0xff] }
 0x477   :  { %1264 = vmatpush2.msra.mxu1 %v1039_v34 }
 0x478   :  { %1265 = vmatprep.subr.mxu1 %v1038_v35 }
 0x479   :  { %1266 = vmatpush2.msra.mxu1 %v1037_v36 }
 0x47a   :  { %1267 = vmatprep.subr.mxu1 %v1036_v4 }
 0x47b   :  { %1268 = vmatpush2.msra.mxu1 %v1035_v37 }
 0x47c   :  { %1269 = vmatprep.subr.mxu1 %v1034_v38 }
 0x47d   :  { %1270 = vmatpush2.msra.mxu1 %v1033_v39 }
 0x47e   :  { %1272 = vmatmul.mubr.f32.vlgmr.msra.gmra.mxu1 %v2400_v41  ;;  %v1320_v41 = vld [vmem:[%s2702_s10 + $0xe8] sm:$0xff]  ;;  %s1537_s10 = smov [#allocation3]  }
 0x47f   :  { %1427 = vmatprep.subr.mxu0 %v1320_v41  ;;  %s1402_s25 = sshll.u32 %s1537_s10, 4  ;;  %s1403_s25 = int_to_ptr.vmem [resolvable:$true] %s1402_s25 }
 0x480   :  { %1428 = vmatpush3.msra.mxu0 %v1304_v45  ;;  %s1505_s27 = scalar_lea.vmem %s1403_s25, 128  ;;  %p1510_p1 = scmp.lt.s32.totalorder %s1403_s25, %s1403_s25 }
 0x481   :  { %1429 = vmatprep.subr.mxu0 %v1319_v46  ;;  %p1506_p0 = scmp.ne.s32.totalorder %s1403_s25, %s1505_s27  ;;  %p1511_p2 = scmp.lt.s32.totalorder %s1505_s27, %s1505_s27 }
 0x482   :  { %1430 = vmatpush3.msra.mxu0 %v1303_v47 }
 0x483   :  { %1431 = vmatprep.subr.mxu0 %v1318_v48  ;;  %p1512_p3 = por %p1511_p2, %p1510_p1 }
 0x484   :  { %1432 = vmatpush3.msra.mxu0 %v1302_v49 }
 0x485   :  { %1433 = vmatprep.subr.mxu0 %v1317_v50  ;;  %p1513_p4 = pnand %p1512_p3, %p1506_p0 }
 0x486   :  { %1434 = vmatpush3.msra.mxu0 %v1301_v51 }
 0x487   :  { %1435 = vmatprep.subr.mxu0 %v1316_v52 }
 0x488   :  { %1436 = vmatpush3.msra.mxu0 %v1300_v53 }
 0x489   :  { %1437 = vmatprep.subr.mxu0 %v1315_v25 }
 0x48a   :  { %1438 = vmatpush3.msra.mxu0 %v1299_v2 }
 0x48b   :  { %1439 = vmatprep.subr.mxu0 %v1314_v54 }
 0x48c   :  { %1440 = vmatpush3.msra.mxu0 %v1298_v55 }
 0x48d   :  { %1441 = vmatprep.subr.mxu0 %v1313_v56 }
 0x48e   :  { %1442 = vmatpush3.msra.mxu0 %v1297_v57 }
 0x48f   :  { %1443 = vmatprep.subr.mxu0 %v1312_v58 }
 0x490   :  { %1444 = vmatpush3.msra.mxu0 %v1296_v59 }
 0x491   :  { %1445 = vmatprep.subr.mxu0 %v1311_v60 }
 0x492   :  { %1446 = vmatpush3.msra.mxu0 %v1295_v61 }
 0x493   :  { %1447 = vmatprep.subr.mxu0 %v1310_v62 }
 0x494   :  { %1448 = vmatpush3.msra.mxu0 %v1294_v63 }
 0x495   :  { %1449 = vmatprep.subr.mxu0 %v1309_v0 }
 0x496   :  { %1450 = vmatpush3.msra.mxu0 %v1293_v1 }
 0x497   :  { %1451 = vmatprep.subr.mxu0 %v1308_v3 }
 0x498   :  { %1452 = vmatpush3.msra.mxu0 %v1292_v5 }
 0x499   :  { %1453 = vmatprep.subr.mxu0 %v1307_v6 }
 0x49a   :  { %1454 = vmatpush3.msra.mxu0 %v1291_v7 }
 0x4fe   :  { %v1131_v9 = vpop.f32.mrf.mxu1  ;;  %v1202_v10 = vpop.f32.mrf.mxu0 }
 0x4ff   :  { %v1203_v17 = vadd.f32 %v1202_v10, %v1131_v9 }
 0x500   :  { %v1133_v13 = vpop.f32.mrf.mxu1  ;;  %v1204_v14 = vpop.f32.mrf.mxu0 }
 0x501   :  { %v1205_v19 = vadd.f32 %v1204_v14, %v1133_v13 }
 0x53e   :  { %v1273_v18 = vpop.f32.mrf.mxu1 }
 0x53f   :  { %v1274_v21 = vadd.f32 %v1273_v18, %v1203_v17 }
 0x540   :  { %v1275_v24 = vpop.f32.mrf.mxu1 }
 0x541   :  { %v1276_v26 = vadd.f32 %v1275_v24, %v1205_v19  ;;  %v1289_v28 = vadd.f32 %v1282_v22, %v1274_v21 }
 0x543   :  { %v1290_v27 = vadd.f32 %v1286_v20, %v1276_v26 }
 0x545   :  { %1387 = vmatprep.mubr.f32.mxu0 %v1290_v27 }
 0x546   :  { %1388 = vmatmul.mubr.f32.vlgmr.msra.gmra.mxu0 %v1289_v28 }
 0x606   :  { %v1455_v29 = vpop.f32.mrf.mxu0 }
 0x608   :  { %v1456_v30 = vpop.f32.mrf.mxu0 }
 0x609   :  { %v1457_v31 = vadd.f32 %v1456_v30, %v1455_v29 }
 0x60b   :  { %v1393_v32 = vmul.f32 %v1457_v31, %v1970_v23 }
 0x60d   :  { %v1394_v34 = vadd.f32 %v1504_v33, %v1393_v32 }
 0x60f   :  { %1395 = vst [vmem:[#allocation3] sm:$0xff] %v1394_v34 }
 0x610   :  { %1516 = shalt.err (!%p1513_p4)
}
 0x611   :  { %1405 = dma.vmem_to_hbm [thread:$0]  %s1403_s25, 128, %s2704_s12, [#allocation4]  }
 0x612   :  { %1525 = dma.done.wait [#allocation4], 128  }
 0x613   :  { %1526 = vsyncadd [#allocation4], 4294967168 }
 0x614   :  { %1409 = vsyncpa [#allocation4], 1 }

</bundles_post_ra>
